<compile_context>
chip_gen: v5e
topology: v5e:2x2
jax: 0.10.0
libtpu: 0.0.40
codegen_flags: <defaults>
</compile_context>

<pallas_src>
import functools

import jax
import jax.numpy as jnp
from jax import lax
from jax.experimental import pallas as pl
from jax.experimental.pallas import tpu as pltpu


def _attention_kernel(x_ref, w_ref, o_ref, *, num_heads, scale, compute_dtype):
    # x_ref: (Bb, C, N) tokens for this block of images, channels-first.
    # w_ref: (3C, C)    fused QKV 1x1-conv weight, rows = [q | k | v].
    # o_ref: (Bb, C, N) attention output, channels-first, '(h d)' channel order.
    Bb, C, N = x_ref.shape
    d = C // num_heads

    w = w_ref[...].astype(compute_dtype)                            # (3C, C)

    for b in range(Bb):                                             # unrolled, small
        xb = x_ref[b].astype(compute_dtype)                         # (C, N)

        # Whole QKV projection as one wide MXU matmul (f32 accumulation):
        # qkv[o, n] = sum_c w[o, c] * x[c, n].
        qkv = jnp.dot(w, xb, preferred_element_type=jnp.float32)    # (3C, N)

        # Sublane slices at multiples of C, then a layout-preserving split of
        # the channel axis into (heads, d).  Softmax scale folded into q
        # (C*N multiplies instead of heads*N*N).
        q = (qkv[:C] * scale).reshape(num_heads, d, N).astype(compute_dtype)
        k = qkv[C:2 * C].reshape(num_heads, d, N).astype(compute_dtype)
        v = qkv[2 * C:].reshape(num_heads, d, N).astype(compute_dtype)

        # Head-batched scores: s[h, n, m] = sum_d q[h, d, n] * k[h, d, m].
        s = lax.dot_general(q, k, (((1,), (1,)), ((0,), (0,))),
                            preferred_element_type=jnp.float32)     # (h, N, N)

        # Numerically-stable softmax; statistics stay in f32 on all chips.
        mx = jnp.max(s, axis=-1, keepdims=True)
        p = jnp.exp(s - mx)
        inv = pl.reciprocal(jnp.sum(p, axis=-1, keepdims=True), approx=True)
        p = (p * inv).astype(compute_dtype)                         # (h, N, N)

        # Head-batched PV: o[h, c, n] = sum_m v[h, c, m] * p[h, n, m].
        o = lax.dot_general(v, p, (((2,), (2,)), ((0,), (0,))),
                            preferred_element_type=jnp.float32)     # (h, d, N)

        # Merge (heads, d) back into C (trailing dim untouched) and store one
        # channels-first (C, N) tile for this image.
        o_ref[b] = o.reshape(C, N).astype(o_ref.dtype)


def _pick_batch_block(B, max_block=8):
    """Largest divisor of B that is <= max_block while keeping >= 2 grid steps
    (so the "parallel" batch axis can split across v7x's two TensorCores)."""
    for bb in range(min(max_block, B), 0, -1):
        if B % bb == 0 and B // bb >= 2:
            return bb
    return B


def attention_forward(x, w_qkv, num_heads, *, compute_dtype=jnp.bfloat16,
                      batch_block=None):
    """x: (B, C, H, W); w_qkv: (3C, C, 1, 1) conv weight (no bias).

    MXU operands are cast to `compute_dtype` (bf16 by default: the native MXU
    rate on v5e/v6e/v7x); softmax math and accumulations stay in f32.  If the
    producer already emits bf16 activations/weights, pass them in bf16 to
    halve HBM traffic of this DMA-bound kernel (do not add a standalone cast).
    """
    B, C, H, W = x.shape
    assert C % num_heads == 0
    N = H * W
    scale = C ** (-0.5)                 # matches the module: in_channels ** -0.5

    # Pure reshapes only -- no HBM transpose passes around the kernel.
    x_cn = x.reshape(B, C, N)           # (B, C, N)
    w_fused = w_qkv.reshape(3 * C, C)   # (3C, C)

    Bb = _pick_batch_block(B) if batch_block is None else batch_block
    assert B % Bb == 0

    out = pl.pallas_call(
        functools.partial(_attention_kernel, num_heads=num_heads, scale=scale,
                          compute_dtype=compute_dtype),
        out_shape=jax.ShapeDtypeStruct((B, C, N), x.dtype),
        grid=(B // Bb,),
        in_specs=[
            pl.BlockSpec((Bb, C, N), lambda i: (i, 0, 0)),
            # Constant index_map: the fused weight is DMA'd once and never
            # re-prefetched between grid steps.
            pl.BlockSpec((3 * C, C), lambda i: (0, 0)),
        ],
        out_specs=pl.BlockSpec((Bb, C, N), lambda i: (i, 0, 0)),
        compiler_params=pltpu.CompilerParams(
            dimension_semantics=("parallel",),   # shard batch blocks across TCs
            vmem_limit_bytes=32 * 1024 * 1024),
    )(x_cn, w_fused)

    # (B, C, N) -> (B, C, H, W): free reshape, channels already in '(h d)' order.
    return out.reshape(B, C, H, W)


def _reference(x, w_qkv, num_heads):
    """Pure-JAX reference mirroring the PyTorch forward (dropout=0)."""
    B, C, H, W = x.shape
    N = H * W
    d = C // num_heads
    w = w_qkv.reshape(3 * C, C)
    qkv = jnp.einsum('oc,bchw->bohw', w, x)
    q, k, v = jnp.split(qkv, 3, axis=1)

    def re(t):  # 'B (h d) H W -> B h (H W) d'
        return t.reshape(B, num_heads, d, N).transpose(0, 1, 3, 2)

    q, k, v = re(q), re(k), re(v)
    attn = jnp.einsum('bhnd,bhmd->bhnm', q, k) * (C ** -0.5)
    attn = jax.nn.softmax(attn, axis=-1)
    o = jnp.einsum('bhnm,bhmd->bhnd', attn, v)
    return o.transpose(0, 1, 3, 2).reshape(B, C, H, W)


if __name__ == "__main__":
    key = jax.random.PRNGKey(0)
    k_x, k_w = jax.random.split(key)

    B, C, H, W = 4, 64, 8, 8
    num_heads = 4

    x = jax.random.normal(k_x, (B, C, H, W), dtype=jnp.float32)

    # Deterministic xavier_uniform init for the 1x1 conv weight (3C, C, 1, 1).
    fan_in, fan_out = C, 3 * C
    bound = (6.0 / (fan_in + fan_out)) ** 0.5
    w_qkv = jax.random.uniform(
        k_w, (3 * C, C, 1, 1), minval=-bound, maxval=bound, dtype=jnp.float32)

    out = attention_forward(x, w_qkv, num_heads)   # Bb=2, grid=(2,), bf16 MXU ops
    jax.block_until_ready(out)

    ref = _reference(x, w_qkv, num_heads)
    assert out.shape == (B, C, H, W)
    # Tolerance covers bf16 MXU operands + the approximate EUP reciprocal;
    # softmax statistics themselves are exact f32.
    assert jnp.allclose(out, ref, atol=2e-2, rtol=2e-2), "Pallas vs reference mismatch"

    print("KERNEL_OK")
</pallas_src>

<mosaic_0001>
module attributes {stable_mosaic.version = 11 : i64} {
  func.func @_attention_kernel(%arg0: i32, %arg1: memref<2x64x64xf32, #tpu.memory_space<vmem>>, %arg2: memref<192x64xf32, #tpu.memory_space<vmem>>, %arg3: memref<2x64x64xf32, #tpu.memory_space<vmem>>) attributes {dimension_semantics = [#tpu.dimension_semantics<parallel>], iteration_bounds = array<i64: 2>, scalar_prefetch = 0 : i64, scratch_operands = 0 : i64, tpu.core_type = #tpu.core_type<tc>, window_params = [{transform_indices = @transform_0, window_bounds = array<i64: 2, 64, 64>}, {pipeline_mode = #tpu.pipeline_mode<synchronous>, transform_indices = @transform_1, window_bounds = array<i64: 192, 64>}, {transform_indices = @transform_2, window_bounds = array<i64: 2, 64, 64>}]} {
    %c0 = arith.constant 0 : index
    %c0_0 = arith.constant 0 : index
    %0 = vector.load %arg2[%c0, %c0_0] : memref<192x64xf32, #tpu.memory_space<vmem>>, vector<192x64xf32>
    %1 = arith.truncf %0 : vector<192x64xf32> to vector<192x64xbf16>
    %c0_1 = arith.constant 0 : index
    %c0_2 = arith.constant 0 : index
    %c0_3 = arith.constant 0 : index
    %2 = vector.load %arg1[%c0_1, %c0_2, %c0_3] : memref<2x64x64xf32, #tpu.memory_space<vmem>>, vector<1x64x64xf32>
    %3 = vector.shape_cast %2 : vector<1x64x64xf32> to vector<64x64xf32>
    %4 = arith.truncf %3 : vector<64x64xf32> to vector<64x64xbf16>
    %cst = arith.constant dense<0.000000e+00> : vector<192x64xf32>
    %5 = tpu.matmul %1, %4, %cst {dimension_numbers = #tpu.dot_dimension_numbers<[1], [0], [0], [1], [0, 0, 1, 1], [], []>} : vector<192x64xbf16>, vector<64x64xbf16>, vector<192x64xf32> -> vector<192x64xf32>
    %6 = vector.extract_strided_slice %5 {offsets = [0, 0], sizes = [64, 64], strides = [1, 1]} : vector<192x64xf32> to vector<64x64xf32>
    %cst_4 = arith.constant 1.250000e-01 : f32
    %7 = vector.broadcast %cst_4 : f32 to vector<64x64xf32>
    %8 = arith.mulf %6, %7 : vector<64x64xf32>
    %9 = vector.shape_cast %8 : vector<64x64xf32> to vector<4x16x64xf32>
    %10 = arith.truncf %9 : vector<4x16x64xf32> to vector<4x16x64xbf16>
    %11 = vector.extract_strided_slice %5 {offsets = [64, 0], sizes = [64, 64], strides = [1, 1]} : vector<192x64xf32> to vector<64x64xf32>
    %12 = vector.shape_cast %11 : vector<64x64xf32> to vector<4x16x64xf32>
    %13 = arith.truncf %12 : vector<4x16x64xf32> to vector<4x16x64xbf16>
    %14 = vector.extract_strided_slice %5 {offsets = [128, 0], sizes = [64, 64], strides = [1, 1]} : vector<192x64xf32> to vector<64x64xf32>
    %15 = vector.shape_cast %14 : vector<64x64xf32> to vector<4x16x64xf32>
    %16 = arith.truncf %15 : vector<4x16x64xf32> to vector<4x16x64xbf16>
    %cst_5 = arith.constant dense<0.000000e+00> : vector<4x64x64xf32>
    %17 = tpu.matmul %10, %13, %cst_5 {dimension_numbers = #tpu.dot_dimension_numbers<[1], [1], [2], [2], [0, 0, 0, 2, 1, 2], [0], [0]>} : vector<4x16x64xbf16>, vector<4x16x64xbf16>, vector<4x64x64xf32> -> vector<4x64x64xf32>
    %cst_6 = arith.constant dense<0xFF800000> : vector<4x64xf32>
    %18 = vector.multi_reduction <maximumf>, %17, %cst_6 [2] : vector<4x64x64xf32> to vector<4x64xf32>
    %19 = vector.shape_cast %18 : vector<4x64xf32> to vector<4x64x1xf32>
    %20 = vector.broadcast %19 : vector<4x64x1xf32> to vector<4x64x64xf32>
    %21 = arith.subf %17, %20 : vector<4x64x64xf32>
    %22 = math.exp %21 : vector<4x64x64xf32>
    %cst_7 = arith.constant dense<0.000000e+00> : vector<4x64xf32>
    %23 = vector.multi_reduction <add>, %22, %cst_7 [2] : vector<4x64x64xf32> to vector<4x64xf32>
    %24 = vector.shape_cast %23 : vector<4x64xf32> to vector<4x64x1xf32>
    %25 = tpu.reciprocal %24 {approx = true} : vector<4x64x1xf32> -> vector<4x64x1xf32>
    %26 = vector.broadcast %25 : vector<4x64x1xf32> to vector<4x64x64xf32>
    %27 = arith.mulf %22, %26 : vector<4x64x64xf32>
    %28 = arith.truncf %27 : vector<4x64x64xf32> to vector<4x64x64xbf16>
    %cst_8 = arith.constant dense<0.000000e+00> : vector<4x16x64xf32>
    %29 = tpu.matmul %16, %28, %cst_8 {dimension_numbers = #tpu.dot_dimension_numbers<[2], [2], [1], [1], [0, 0, 0, 1, 1, 1], [0], [0]>} : vector<4x16x64xbf16>, vector<4x64x64xbf16>, vector<4x16x64xf32> -> vector<4x16x64xf32>
    %30 = vector.shape_cast %29 : vector<4x16x64xf32> to vector<64x64xf32>
    %c0_9 = arith.constant 0 : index
    %c0_10 = arith.constant 0 : index
    %c0_11 = arith.constant 0 : index
    %31 = vector.load %arg3[%c0_9, %c0_10, %c0_11] : memref<2x64x64xf32, #tpu.memory_space<vmem>>, vector<1x64x64xf32>
    %32 = vector.shape_cast %31 : vector<1x64x64xf32> to vector<64x64xf32>
    %33 = vector.shape_cast %30 : vector<64x64xf32> to vector<1x64x64xf32>
    tpu.vector_store %arg3[%c0_9, %c0_10, %c0_11], %33 {strides = array<i32>} : memref<2x64x64xf32, #tpu.memory_space<vmem>>, vector<1x64x64xf32>,
    %c1 = arith.constant 1 : index
    %c0_12 = arith.constant 0 : index
    %c0_13 = arith.constant 0 : index
    %34 = vector.load %arg1[%c1, %c0_12, %c0_13] : memref<2x64x64xf32, #tpu.memory_space<vmem>>, vector<1x64x64xf32>
    %35 = vector.shape_cast %34 : vector<1x64x64xf32> to vector<64x64xf32>
    %36 = arith.truncf %35 : vector<64x64xf32> to vector<64x64xbf16>
    %cst_14 = arith.constant dense<0.000000e+00> : vector<192x64xf32>
    %37 = tpu.matmul %1, %36, %cst_14 {dimension_numbers = #tpu.dot_dimension_numbers<[1], [0], [0], [1], [0, 0, 1, 1], [], []>} : vector<192x64xbf16>, vector<64x64xbf16>, vector<192x64xf32> -> vector<192x64xf32>
    %38 = vector.extract_strided_slice %37 {offsets = [0, 0], sizes = [64, 64], strides = [1, 1]} : vector<192x64xf32> to vector<64x64xf32>
    %cst_15 = arith.constant 1.250000e-01 : f32
    %39 = vector.broadcast %cst_15 : f32 to vector<64x64xf32>
    %40 = arith.mulf %38, %39 : vector<64x64xf32>
    %41 = vector.shape_cast %40 : vector<64x64xf32> to vector<4x16x64xf32>
    %42 = arith.truncf %41 : vector<4x16x64xf32> to vector<4x16x64xbf16>
    %43 = vector.extract_strided_slice %37 {offsets = [64, 0], sizes = [64, 64], strides = [1, 1]} : vector<192x64xf32> to vector<64x64xf32>
    %44 = vector.shape_cast %43 : vector<64x64xf32> to vector<4x16x64xf32>
    %45 = arith.truncf %44 : vector<4x16x64xf32> to vector<4x16x64xbf16>
    %46 = vector.extract_strided_slice %37 {offsets = [128, 0], sizes = [64, 64], strides = [1, 1]} : vector<192x64xf32> to vector<64x64xf32>
    %47 = vector.shape_cast %46 : vector<64x64xf32> to vector<4x16x64xf32>
    %48 = arith.truncf %47 : vector<4x16x64xf32> to vector<4x16x64xbf16>
    %cst_16 = arith.constant dense<0.000000e+00> : vector<4x64x64xf32>
    %49 = tpu.matmul %42, %45, %cst_16 {dimension_numbers = #tpu.dot_dimension_numbers<[1], [1], [2], [2], [0, 0, 0, 2, 1, 2], [0], [0]>} : vector<4x16x64xbf16>, vector<4x16x64xbf16>, vector<4x64x64xf32> -> vector<4x64x64xf32>
    %cst_17 = arith.constant dense<0xFF800000> : vector<4x64xf32>
    %50 = vector.multi_reduction <maximumf>, %49, %cst_17 [2] : vector<4x64x64xf32> to vector<4x64xf32>
    %51 = vector.shape_cast %50 : vector<4x64xf32> to vector<4x64x1xf32>
    %52 = vector.broadcast %51 : vector<4x64x1xf32> to vector<4x64x64xf32>
    %53 = arith.subf %49, %52 : vector<4x64x64xf32>
    %54 = math.exp %53 : vector<4x64x64xf32>
    %cst_18 = arith.constant dense<0.000000e+00> : vector<4x64xf32>
    %55 = vector.multi_reduction <add>, %54, %cst_18 [2] : vector<4x64x64xf32> to vector<4x64xf32>
    %56 = vector.shape_cast %55 : vector<4x64xf32> to vector<4x64x1xf32>
    %57 = tpu.reciprocal %56 {approx = true} : vector<4x64x1xf32> -> vector<4x64x1xf32>
    %58 = vector.broadcast %57 : vector<4x64x1xf32> to vector<4x64x64xf32>
    %59 = arith.mulf %54, %58 : vector<4x64x64xf32>
    %60 = arith.truncf %59 : vector<4x64x64xf32> to vector<4x64x64xbf16>
    %cst_19 = arith.constant dense<0.000000e+00> : vector<4x16x64xf32>
    %61 = tpu.matmul %48, %60, %cst_19 {dimension_numbers = #tpu.dot_dimension_numbers<[2], [2], [1], [1], [0, 0, 0, 1, 1, 1], [0], [0]>} : vector<4x16x64xbf16>, vector<4x64x64xbf16>, vector<4x16x64xf32> -> vector<4x16x64xf32>
    %62 = vector.shape_cast %61 : vector<4x16x64xf32> to vector<64x64xf32>
    %c1_20 = arith.constant 1 : index
    %c0_21 = arith.constant 0 : index
    %c0_22 = arith.constant 0 : index
    %63 = vector.load %arg3[%c1_20, %c0_21, %c0_22] : memref<2x64x64xf32, #tpu.memory_space<vmem>>, vector<1x64x64xf32>
    %64 = vector.shape_cast %63 : vector<1x64x64xf32> to vector<64x64xf32>
    %65 = vector.shape_cast %62 : vector<64x64xf32> to vector<1x64x64xf32>
    tpu.vector_store %arg3[%c1_20, %c0_21, %c0_22], %65 {strides = array<i32>} : memref<2x64x64xf32, #tpu.memory_space<vmem>>, vector<1x64x64xf32>,
    return
  }
  func.func @transform_0(%arg0: i32) -> (i32, i32, i32) {
    %c0_i32 = arith.constant 0 : i32
    %c0_i32_0 = arith.constant 0 : i32
    %c0_i32_1 = arith.constant 0 : i32
    return %arg0, %c0_i32, %c0_i32_0 : i32, i32, i32
  }
  func.func @transform_1(%arg0: i32) -> (i32, i32) {
    %c0_i32 = arith.constant 0 : i32
    %c0_i32_0 = arith.constant 0 : i32
    %c0_i32_1 = arith.constant 0 : i32
    return %c0_i32, %c0_i32_0 : i32, i32
  }
  func.func @transform_2(%arg0: i32) -> (i32, i32, i32) {
    %c0_i32 = arith.constant 0 : i32
    %c0_i32_0 = arith.constant 0 : i32
    %c0_i32_1 = arith.constant 0 : i32
    return %arg0, %c0_i32, %c0_i32_0 : i32, i32, i32
  }
}

</mosaic_0001>

<bundles_post_ra>
// kernel: tpu_custom_call.1
= control target key start
LH: loop header
LB: loop body
LE: loop exit
PB: predicated region body
PF: predicated region fallthrough
CT: control target
= control target key end

     0   :  { %7 = vsyncpa [#allocation3], 0  ;;  %s3907_s0 = inlined_call_operand.vmem [shape: f32[4,64,64], index: 0, kind: input, shape index: {}]   ;;  %s3908_s1 = inlined_call_operand.vmem [shape: f32[192,64], index: 1, kind: input, shape index: {}]   ;;  %s3909_s2 = inlined_call_operand.hbm [shape: f32[4,64,64], index: 2, kind: output, shape index: {}]  }
   0x1   :  { %9 = vsyncpa [#allocation3 + $0x1], 0  ;;  %s2811_s9 = smov 0   ;;  %s2813_s10 = smov 0  }
   0x2   :  { %s2815_s11 = smov 0   ;;  %s2817_s12 = smov 0  }
   0x3 LB: > { %s2832_s13 = sadd.s32 4294967295, %s2792_s12   ;;  %s2298_s14 = sadd.s32 4294967294, %s2792_s12   ;;  %s2792_s12 = sphi %s2817_s12, %s3915_s12   ;;  %s2788_s11 = sphi %s2815_s11, %s3914_s11   ;;  %s2784_s10 = sphi %s2813_s10, %s3913_s10   ;;  %s2780_s9 = sphi %s2811_s9, %s3912_s9  }
   0x4   : > { %s2836_s15 = sadd.s32 1, %s2792_s12   ;;  %s69_s16 = sadd.s32 1, %s2788_s11 }
   0x5   : > { %s66_s17 = ssub.s32 %s2792_s12, %s2836_s15  ;;  %p79_p0 = scmp.ne.s32.totalorder %s2788_s11, %s2784_s10 }
   0x6   : > { %p67_p1 = scmp.eq.s32.totalorder %s66_s17, 0  ;;  %p80_p2 = scmp.eq.s32.totalorder %s2832_s13, 1 }
   0x7   : > { %p85_p3 = scmp.ne.s32.totalorder %s2784_s10, %s2780_s9  ;;  %p86_p4 = scmp.eq.s32.totalorder %s2298_s14, 1 }
   0x8   : > { %s2847_s18 = scalar_select %p67_p1, %s2788_s11, %s69_s16  }
   0x9   : > { %p2849_p5 = por %p80_p2, %p79_p0  ;;  %p2853_p6 = por %p86_p4, %p85_p3 }
   0xa   : > { %p2301_p7 = scmp.ge.s32.totalorder %s2792_s12, 1  ;;  %p117_p8 = scmp.lt.s32.totalorder %s2792_s12, 3 }
   0xc   : > { %p118_p9 = pnand %p2301_p7, %p117_p8 }
   0xd   : > { %s2303_s21 = sshll.u32 (!%p118_p9), %s2832_s13, 1  ;;  %s2750_s4 = scalar_lea.hbm (!%p118_p9), %s3909_s2, 256 }
   0xe   : > { %121 = sbr.rel (%p118_p9) target bundleno = 2157 (0x86d), region = 28  ;;  %p141_p10 = scmp.lt.s32.totalorder (!%p118_p9), %s2303_s21, 3 }
  0x13   : > { %s3917_s21 = smov (!%p141_p10, %s2303_s21), 3  ;;  %v149_v12 = vld [vmem:[%s3908_s1] sm:$0xff]  ;;  %v150_v13 = vld [vmem:[%s3908_s1 + $0x8] sm:$0xff]  ;;  %vm197_vm0 = vcmask 523264   ;;  %v151_v15 = vld [vmem:[%s3908_s1 + $0x10] sm:$0xff]  ;;  %vm363_vm1 = vcmask 130048  }
  0x14   : > { %s2392_s22 = sshll.u32 %s3917_s21, 6  ;;  %v2879_v14 = vpack.c.bf16 %v150_v13, %v149_v12  ;;  %v152_v16 = vld [vmem:[%s3908_s1 + $0x18] sm:$0xff]  ;;  %v153_v18 = vld [vmem:[%s3908_s1 + $0x20] sm:$0xff]  ;;  %v154_v19 = vld [vmem:[%s3908_s1 + $0x28] sm:$0xff]  ;;  %s2394_s21 = sshll.u32 %s2832_s13, 7 }
  0x15   : > { %s2863_s25 = scalar_lea.vmem %s3907_s0, %s2392_s22  ;;  %v2889_v17 = vpack.c.bf16 %v152_v16, %v151_v15  ;;  %v2899_v20 = vpack.c.bf16 %v154_v19, %v153_v18  ;;  %v155_v22 = vld [vmem:[%s3908_s1 + $0x30] sm:$0xff]  ;;  %v156_v23 = vld [vmem:[%s3908_s1 + $0x38] sm:$0xff]  ;;  %v157_v27 = vld [vmem:[%s3908_s1 + $0x40] sm:$0xff]  ;;  %s2232_s24 = scalar_lea.hbm %s3909_s2, %s2394_s21 }
  0x16   : > { %v191_v0 = vld [vmem:[%s2863_s25 + $0x30] sm:$0xff]  ;;  %v192_v1 = vld [vmem:[%s2863_s25 + $0x38] sm:$0xff]  ;;  %v189_v2 = vld [vmem:[%s2863_s25 + $0x20] sm:$0xff]  ;;  %v2909_v24 = vpack.c.bf16 %v156_v23, %v155_v22  ;;  %s2235_s27 = sshll.u32 %s2232_s24, 4  ;;  %s2236_s27 = int_to_ptr.hbm [resolvable:$true] %s2235_s27 }
  0x17   : > { %v196_v3 = vpack.c.bf16 %v192_v1, %v191_v0  ;;  %v190_v4 = vld [vmem:[%s2863_s25 + $0x28] sm:$0xff]  ;;  %v187_v6 = vld [vmem:[%s2863_s25 + $0x10] sm:$0xff]  ;;  %v188_v7 = vld [vmem:[%s2863_s25 + $0x18] sm:$0xff]  ;;  %s2744_s28 = sshra.s32 %s2236_s27, 4  ;;  %s2745_s28 = int_to_ptr.hbm [resolvable:$true] %s2744_s28 }
  0x18   : > { %v195_v5 = vpack.c.bf16 %v190_v4, %v189_v2  ;;  %v194_v8 = vpack.c.bf16 %v188_v7, %v187_v6  ;;  %v185_v9 = vld [vmem:[%s2863_s25] sm:$0xff]  ;;  %v186_v10 = vld [vmem:[%s2863_s25 + $0x8] sm:$0xff]  ;;  %v159_v32 = vld [vmem:[%s3908_s1 + $0x50] sm:$0xff]  ;;  %s2746_s29 = scalar_lea.hbm %s2745_s28, 128  ;;  %p2751_p0 = scmp.lt.s32.totalorder %s2745_s28, %s3909_s2 }
  0x19   : > { %238 = vmatpush.bf16.msra.mxu0 %v196_v3  ;;  %v193_v11 = vpack.c.bf16 %v186_v10, %v185_v9  ;;  %v158_v28 = vld [vmem:[%s3908_s1 + $0x48] sm:$0xff]  ;;  %v160_v33 = vld [vmem:[%s3908_s1 + $0x58] sm:$0xff]  ;;  %v161_v50 = vld [vmem:[%s3908_s1 + $0x60] sm:$0xff]  ;;  %p2747_p11 = scmp.ne.s32.totalorder %s2745_s28, %s2746_s29  ;;  %p2752_p1 = scmp.lt.s32.totalorder %s2750_s4, %s2746_s29 }
  0x1a   : > { %v2921_v29 = vpack.c.bf16 %v158_v28, %v157_v27  ;;  %v2933_v35 = vpack.c.bf16 %v160_v33, %v159_v32  ;;  %v162_v51 = vld [vmem:[%s3908_s1 + $0x68] sm:$0xff] }
  0x1b   : > { %v2943_v52 = vpack.c.bf16 %v162_v51, %v161_v50  ;;  %p2748_p12 = pnand %p2747_p11, %p2849_p5  ;;  %p2753_p2 = por %p2752_p1, %p2751_p0 }
  0x1d   : > { %239 = vmatpush.bf16.msra.mxu0 %v195_v5  ;;  %p2749_p13 = pneg %p2748_p12 }
  0x1f   : > { %p2754_p3 = pnand %p2753_p2, %p2749_p13 }
  0x21   : > { %240 = vmatpush.bf16.msra.mxu0 %v194_v8 }
  0x25   : > { %241 = vmatpush.bf16.msra.mxu0 %v193_v11 }
  0x28   : > { %2306 = vmatmul.msk.bf16.vlgmr.msra.gmra.mxu0 %vm197_vm0, %v2879_v14 }
  0x38   : > { %2307 = vmatmul.msk.bf16.gmra.mxu0 %vm197_vm0, %v2889_v17 }
  0x48   : > { %2308 = vmatmul.msk.bf16.gmra.mxu0 %vm197_vm0, %v2899_v20 }
  0x58   : > { %2309 = vmatmul.msk.bf16.gmra.mxu0 %vm197_vm0, %v2909_v24 }
  0x68   : > { %2310 = vmatmul.msk.bf16.gmra.mxu0 %vm197_vm0, %v2921_v29 }
  0x78   : > { %2311 = vmatmul.msk.bf16.gmra.mxu0 %vm197_vm0, %v2933_v35 }
  0x88   : > { %2312 = vmatmul.msk.bf16.gmra.mxu0 %vm197_vm0, %v2943_v52 }
  0xa5   : > { %v243_v21 = vpop.f32.mrf.mxu0 }
  0xa6   : > { %v303_v36 = vmul.f32 0.125, %v243_v21 }
  0xa8   : > { %v311_v40 = vpack.c.bf16 %v303_v36, %v303_v36 }
  0xaa   : > { %v337_v45 = vunpack.c.l.b16 %v311_v40 }
  0xad   : > { %v245_v25 = vpop.f32.mrf.mxu0 }
  0xae   : > { %v304_v34 = vmul.f32 0.125, %v245_v25 }
  0xb0   : > { %v312_v38 = vpack.c.bf16 %v304_v34, %v304_v34 }
  0xb2   : > { %v338_v43 = vunpack.c.l.b16 %v312_v38 }
  0xb4   : > { %v339_v48 = vpack.c.b16 %v338_v43, %v337_v45 }
  0xb5   : > { %v2913_v26 = vpop.f32.mrf.mxu0 }
  0xbd   : > { %v2925_v30 = vpop.f32.mrf.mxu0 }
  0xc5   : > { %v253_v31 = vpop.f32.mrf.mxu0 }
  0xc6   : > { %v307_v37 = vmul.f32 0.125, %v253_v31 }
  0xc8   : > { %v315_v41 = vpack.c.bf16 %v307_v37, %v307_v37 }
  0xca   : > { %v476_v46 = vunpack.c.l.b16 %v315_v41 }
  0xcd   : > { %v255_v39 = vpop.f32.mrf.mxu0 }
  0xce   : > { %v308_v42 = vmul.f32 0.125, %v255_v39 }
  0xd0   : > { %v316_v44 = vpack.c.bf16 %v308_v42, %v308_v42 }
  0xd2   : > { %v477_v47 = vunpack.c.l.b16 %v316_v44 }
  0xd4   : > { %v478_v49 = vpack.c.b16 %v477_v47, %v476_v46 }
  0xd5   : > { %v2947_v53 = vpop.f32.mrf.mxu0 }
  0xd6   : > { %2438 = vxpose.binary.xlu0.c.b16.start.end [1/2] (short) (narrow) %v478_v49, %v339_v48, 64 }
  0xdd   : > { %v2949_v54 = vpop.f32.mrf.mxu0 }
  0xe5   : > { %v263_v55 = vpop.f32.mrf.mxu0 }
  0xe6   : > { %v319_v56 = vpack.c.bf16 %v263_v55, %v263_v55 }
  0xe8   : > { %v359_v58 = vunpack.c.l.b16 %v319_v56 }
  0xed   : > { %v265_v57 = vpop.f32.mrf.mxu0 }
  0xee   : > { %v320_v59 = vpack.c.bf16 %v265_v57, %v265_v57 }
  0xf0   : > { %v360_v60 = vunpack.c.l.b16 %v320_v59  ;;  %v163_v59 = vld [vmem:[%s3908_s1 + $0x70] sm:$0xff] }
  0xf2   : > { %v361_v61 = vpack.c.b16 %v360_v60, %v359_v58  ;;  %v164_v60 = vld [vmem:[%s3908_s1 + $0x78] sm:$0xff] }
  0xf4   : > { %383 = vmatpush.bf16.msra.mxu1 %v361_v61  ;;  %v3018_v61 = vpack.c.bf16 %v164_v60, %v163_v59 }
  0xf5   : > { %v268_v62 = vpop.f32.mrf.mxu0 }
  0xf6   : > { %v321_v63 = vpack.c.bf16 %v268_v62, %v268_v62  ;;  %2313 = vmatmul.msk.bf16.gmra.mxu0 %vm197_vm0, %v3018_v61 }
  0xf8   : > { %v429_v1 = vunpack.c.l.b16 %v321_v63 }
  0xfd   : > { %v270_v0 = vpop.f32.mrf.mxu0 }
  0xfe   : > { %v322_v2 = vpack.c.bf16 %v270_v0, %v270_v0  ;;  %v306_v0 = vmul.f32 0.125, %v2925_v30 }
 0x100   : > { %v430_v3 = vunpack.c.l.b16 %v322_v2  ;;  %v310_v2 = vmul.f32 0.125, %v2949_v54 }
 0x102   : > { %v431_v4 = vpack.c.b16 %v430_v3, %v429_v1  ;;  %v309_v1 = vmul.f32 0.125, %v2947_v53 }
 0x104   : > { %452 = vmatpush.bf16.msrb.mxu0 %v431_v4  ;;  %2395 = vmatpush.bf16.msra.mxu2 %v431_v4  ;;  %v305_v4 = vmul.f32 0.125, %v2913_v26 }
 0x105   : > { %v273_v5 = vpop.f32.mrf.mxu0 }
 0x106   : > { %v323_v6 = vpack.c.bf16 %v273_v5, %v273_v5  ;;  %v314_v5 = vpack.c.bf16 %v306_v0, %v306_v0 }
 0x108   : > { %v498_v8 = vunpack.c.l.b16 %v323_v6  ;;  %v317_v6 = vpack.c.bf16 %v309_v1, %v309_v1 }
 0x10d   : > { %v275_v7 = vpop.f32.mrf.mxu0 }
 0x10e   : > { %v324_v9 = vpack.c.bf16 %v275_v7, %v275_v7  ;;  %v318_v7 = vpack.c.bf16 %v310_v2, %v310_v2 }
 0x110   : > { %v499_v10 = vunpack.c.l.b16 %v324_v9  ;;  %v313_v9 = vpack.c.bf16 %v305_v4, %v305_v4 }
 0x112   : > { %v500_v11 = vpack.c.b16 %v499_v10, %v498_v8  ;;  %v408_v10 = vunpack.c.l.b16 %v314_v5  ;;  %v407_v30 = vunpack.c.l.b16 %v313_v9 }
 0x114   : > { %521 = vmatpush.bf16.msra.mxu3 %v500_v11  ;;  %v545_v11 = vunpack.c.l.b16 %v317_v6 }
 0x182   : > { %v2439_v12 = vpop.trf.xlu0 }
 0x183   : > { %2318 = vmatmul.msk.bf16.vlgmr.msra.gmra.mxu1 %vm363_vm1, %v2439_v12  ;;  %v546_v12 = vunpack.c.l.b16 %v318_v7 }
 0x185   : > { %v547_v53 = vpack.c.b16 %v546_v12, %v545_v11 }
 0x18a   : > { %v2440_v13 = vpop.trf.xlu0 }
 0x18b   : > { %2326 = vmatmul.msk.bf16.vlgmr.msra.gmra.mxu3 %vm363_vm1, %v2440_v13  ;;  %v409_v13 = vpack.c.b16 %v408_v10, %v407_v30 }
 0x192   : > { %v2441_v15 = vpop.trf.xlu0 }
 0x193   : > { %2319 = vmatmul.msk.bf16.gmra.mxu1 %vm363_vm1, %v2441_v15 }
 0x19a   : > { %v2442_v16 = vpop.trf.xlu0 }
 0x19b   : > { %2327 = vmatmul.msk.bf16.gmra.mxu3 %vm363_vm1, %v2442_v16 }
 0x1a2   : > { %v2443_v18 = vpop.trf.xlu0 }
 0x1a3   : > { %2320 = vmatmul.msk.bf16.gmra.mxu1 %vm363_vm1, %v2443_v18 }
 0x1aa   : > { %v2444_v19 = vpop.trf.xlu0 }
 0x1ab   : > { %2328 = vmatmul.msk.bf16.gmra.mxu3 %vm363_vm1, %v2444_v19 }
 0x1b2   : > { %v2445_v21 = vpop.trf.xlu0 }
 0x1b3   : > { %2321 = vmatmul.msk.bf16.gmra.mxu1 %vm363_vm1, %v2445_v21 }
 0x1ba   : > { %v2446_v22 = vpop.trf.xlu0 }
 0x1bb   : > { %2329 = vmatmul.msk.bf16.gmra.mxu3 %vm363_vm1, %v2446_v22 }
 0x200   : > { %v2959_v23 = vpop.f32.mrf.mxu1 }
 0x201   : > { %v612_v47 = vsel %vm197_vm0, %v2959_v23, -inf }
 0x208   : > { %v2961_v25 = vpop.f32.mrf.mxu1 }
 0x209   : > { %v615_v42 = vsel %vm197_vm0, %v2961_v25, -inf }
 0x20e   : > { %v2963_v27 = vpop.f32.mrf.mxu3 }
 0x20f   : > { %v660_v62 = vsel %vm197_vm0, %v2963_v27, -inf }
 0x210   : > { %v2965_v28 = vpop.f32.mrf.mxu1 }
 0x211   : > { %v618_v43 = vsel %vm197_vm0, %v2965_v28, -inf }
 0x216   : > { %v2967_v31 = vpop.f32.mrf.mxu3 }
 0x217   : > { %v663_v63 = vsel %vm197_vm0, %v2967_v31, -inf }
 0x218   : > { %v2969_v32 = vpop.f32.mrf.mxu1 }
 0x219   : > { %v621_v38 = vsel %vm197_vm0, %v2969_v32, -inf }
 0x21e   : > { %v2971_v33 = vpop.f32.mrf.mxu3 }
 0x21f   : > { %v666_v57 = vsel %vm197_vm0, %v2971_v33, -inf }
 0x220   : > { %v2973_v34 = vpop.f32.mrf.mxu1 }
 0x221   : > { %v624_v36 = vsel %vm197_vm0, %v2973_v34, -inf }
 0x222   : > { %625 = vmax.xlane.f32.xlu1 %v624_v36 }
 0x226   : > { %v2983_v40 = vpop.f32.mrf.mxu3 }
 0x227   : > { %v669_v58 = vsel %vm197_vm0, %v2983_v40, -inf }
 0x228   : > { %v2977_v37 = vpop.f32.mrf.mxu1 }
 0x229   : > { %v627_v39 = vsel %vm197_vm0, %v2977_v37, -inf }
 0x22a   : > { %622 = vmax.xlane.f32.xlu1 %v621_v38  ;;  %628 = vmax.xlane.f32.xlu2 %v627_v39 }
 0x22e   : > { %v2990_v45 = vpop.f32.mrf.mxu3 }
 0x22f   : > { %v672_v50 = vsel %vm197_vm0, %v2990_v45, -inf }
 0x230   : > { %v400_v41 = vpop.f32.mrf.mxu1 }
 0x231   : > { %v630_v44 = vsel %vm197_vm0, %v400_v41, -inf }
 0x232   : > { %616 = vmax.xlane.f32.xlu1 %v615_v42  ;;  %619 = vmax.xlane.f32.xlu2 %v618_v43 }
 0x233   : > { %631 = vmax.xlane.f32.xlu0 %v630_v44 }
 0x236   : > { %v2998_v49 = vpop.f32.mrf.mxu3 }
 0x237   : > { %v675_v51 = vsel %vm197_vm0, %v2998_v49, -inf }
 0x238   : > { %v2992_v46 = vpop.f32.mrf.mxu1 }
 0x239   : > { %v633_v48 = vsel %vm197_vm0, %v2992_v46, -inf }
 0x23a   : > { %613 = vmax.xlane.f32.xlu2 %v612_v47  ;;  %634 = vmax.xlane.f32.xlu1 %v633_v48 }
 0x23e   : > { %v3004_v55 = vpop.f32.mrf.mxu3 }
 0x23f   : > { %v678_v56 = vsel %vm197_vm0, %v3004_v55, -inf }
 0x242   : > { %673 = vmax.xlane.f32.xlu2 %v672_v50  ;;  %676 = vmax.xlane.f32.xlu1 %v675_v51 }
 0x246   : > { %v3029_v3 = vpop.f32.mrf.mxu3 }
 0x247   : > { %v681_v8 = vsel %vm197_vm0, %v3029_v3, -inf }
 0x24a   : > { %667 = vmax.xlane.f32.xlu1 %v666_v57  ;;  %679 = vmax.xlane.f32.xlu2 %v678_v56 }
 0x252   : > { %670 = vmax.xlane.f32.xlu1 %v669_v58 }
 0x25a   : > { %661 = vmax.xlane.f32.xlu1 %v660_v62 }
 0x262   : > { %664 = vmax.xlane.f32.xlu1 %v663_v63  ;;  %v168_v63 = vld [vmem:[%s3908_s1 + $0x98] sm:$0xff] }
 0x26a   : > { %682 = vmax.xlane.f32.xlu1 %v681_v8 }
 0x273   : > { %2447 = vxpose.binary.xlu2.c.b16.start.end [1/2] (short) (narrow) %v547_v53, %v409_v13, 64  ;;  %v169_v13 = vld [vmem:[%s3908_s1 + $0xa0] sm:$0xff]  ;;  %v170_v53 = vld [vmem:[%s3908_s1 + $0xa8] sm:$0xff] }
 0x295   : > { %v626_v54 = vpop.xlane.xlu1 %625 }
 0x296   : > { %v712_v21 = vsub.f32 %v2973_v34, %v626_v54  ;;  %v166_v34 = vld [vmem:[%s3908_s1 + $0x88] sm:$0xff] }
 0x298   : > { %v748_v38 = vmul.f32 1.442695, %v712_v21 }
 0x29d   : > { %v623_v15 = vpop.xlane.xlu1 %622  ;;  %v629_v22 = vpop.xlane.xlu2 %628 }
 0x29e   : > { %v713_v42 = vsub.f32 %v2977_v37, %v629_v22  ;;  %v711_v60 = vsub.f32 %v2969_v32, %v623_v15 }
 0x2a0   : > { %v750_v48 = vmul.f32 1.442695, %v713_v42  ;;  %v746_v0 = vmul.f32 1.442695, %v711_v60 }
 0x2a5   : > { %v617_v16 = vpop.xlane.xlu1 %616  ;;  %v620_v50 = vpop.xlane.xlu2 %619 }
 0x2a6   : > { %v632_v18 = vpop.xlane.xlu0 %631  ;;  %v710_v51 = vsub.f32 %v2965_v28, %v620_v50  ;;  %v167_v28 = vld [vmem:[%s3908_s1 + $0x90] sm:$0xff]  ;;  %v709_v12 = vsub.f32 %v2961_v25, %v617_v16  ;;  %v3099_v16 = vpack.c.bf16 %v170_v53, %v169_v13 }
 0x2a7   : > { %v714_v26 = vsub.f32 %v400_v41, %v632_v18  ;;  %v165_v41 = vld [vmem:[%s3908_s1 + $0x80] sm:$0xff]  ;;  %v3072_v2 = vpack.c.bf16 %v168_v63, %v167_v28 }
 0x2a8   : > { %v3050_v47 = vpack.c.bf16 %v166_v34, %v165_v41  ;;  %v744_v58 = vmul.f32 1.442695, %v710_v51  ;;  %v742_v54 = vmul.f32 1.442695, %v709_v12 }
 0x2a9   : > { %v752_v19 = vmul.f32 1.442695, %v714_v26 }
 0x2aa   : > { %2314 = vmatmul.msk.bf16.gmra.mxu0 %vm197_vm0, %v3050_v47 }
 0x2ab   : > { %2474 = vpow2.f32 %v752_v19 }
 0x2ac   : > { %2476 = vpow2.f32 %v748_v38  ;;  %v278_v38 = vpop.f32.mrf.mxu0 }
 0x2ad   : > { %v3035_v36 = vpop.xlane.xlu1 %634  ;;  %2478 = vpow2.f32 %v750_v48  ;;  %v614_v32 = vpop.xlane.xlu2 %613  ;;  %v325_v50 = vpack.c.bf16 %v278_v38, %v278_v38 }
 0x2ae   : > { %2480 = vpow2.f32 %v744_v58  ;;  %v708_v7 = vsub.f32 %v2959_v23, %v614_v32  ;;  %v172_v58 = vld [vmem:[%s3908_s1 + $0xb8] sm:$0xff] }
 0x2af   : > { %2482 = vpow2.f32 %v746_v0  ;;  %v567_v0 = vunpack.c.l.b16 %v325_v50 }
 0x2b0   : > { %v740_v10 = vmul.f32 1.442695, %v708_v7 }
 0x2b1   : > { %v3037_v39 = vpop.eup %2474 }
 0x2b2   : > { %v822_v43 = vsel %vm197_vm0, %v3037_v39, 0.0  ;;  %v3054_v37 = vpop.eup %2476 }
 0x2b3   : > { %823 = vadd.xlane.f32.xlu1 %v822_v43  ;;  %v816_v56 = vsel %vm197_vm0, %v3054_v37, 0.0  ;;  %v3061_v59 = vpop.eup %2478 }
 0x2b4   : > { %v819_v62 = vsel %vm197_vm0, %v3061_v59, 0.0  ;;  %v3077_v5 = vpop.eup %2480  ;;  %v280_v51 = vpop.f32.mrf.mxu0 }
 0x2b5   : > { %v3048_v44 = vpop.xlane.xlu1 %676  ;;  %v810_v8 = vsel %vm197_vm0, %v3077_v5, 0.0  ;;  %v3084_v11 = vpop.eup %2482  ;;  %v326_v60 = vpack.c.bf16 %v280_v51, %v280_v51 }
 0x2b6   : > { %v813_v23 = vsel %vm197_vm0, %v3084_v11, 0.0  ;;  %v674_v15 = vpop.xlane.xlu2 %673 }
 0x2b7   : > { %v728_v21 = vsub.f32 %v2990_v45, %v674_v15 }
 0x2b9   : > { %v780_v42 = vmul.f32 1.442695, %v728_v21 }
 0x2ba   : > { %2315 = vmatmul.msk.bf16.gmra.mxu0 %vm197_vm0, %v3072_v2 }
 0x2bb   : > { %817 = vadd.xlane.f32.xlu1 %v816_v56  ;;  %v171_v56 = vld [vmem:[%s3908_s1 + $0xb0] sm:$0xff] }
 0x2bd   : > { %v3059_v57 = vpop.xlane.xlu1 %667 }
 0x2be   : > { %v680_v41 = vpop.xlane.xlu2 %679 }
 0x2bf   : > { %v730_v48 = vsub.f32 %v3004_v55, %v680_v41 }
 0x2c1   : > { %v784_v28 = vmul.f32 1.442695, %v730_v48 }
 0x2c3   : > { %820 = vadd.xlane.f32.xlu1 %v819_v62  ;;  %v3124_v62 = vpack.c.bf16 %v172_v58, %v171_v56 }
 0x2c5   : > { %v671_v1 = vpop.xlane.xlu1 %670 }
 0x2c6   : > { %v727_v4 = vsub.f32 %v2983_v40, %v671_v1  ;;  %v568_v1 = vunpack.c.l.b16 %v326_v60 }
 0x2c8   : > { %v778_v6 = vmul.f32 1.442695, %v727_v4 }
 0x2ca   : > { %2484 = vpow2.f32 %v778_v6  ;;  %2316 = vmatmul.msk.bf16.gmra.mxu0 %vm197_vm0, %v3099_v16  ;;  %v569_v6 = vpack.c.b16 %v568_v1, %v567_v0 }
 0x2cb   : > { %811 = vadd.xlane.f32.xlu1 %v810_v8  ;;  %2486 = vpow2.f32 %v740_v10  ;;  %v729_v10 = vsub.f32 %v2998_v49, %v3048_v44  ;;  %v715_v49 = vsub.f32 %v2992_v46, %v3035_v36 }
 0x2cc   : > { %2488 = vpow2.f32 %v742_v54  ;;  %590 = vmatpush.bf16.msrb.mxu1 %v569_v6 }
 0x2cd   : > { %v3082_v9 = vpop.xlane.xlu1 %661 }
 0x2ce   : > { %v724_v44 = vsub.f32 %v2963_v27, %v3082_v9 }
 0x2d0   : > { %v3086_v40 = vpop.eup %2484 }
 0x2d1   : > { %v861_v30 = vsel %vm197_vm0, %v3086_v40, 0.0  ;;  %v3104_v26 = vpop.eup %2486 }
 0x2d2   : > { %862 = vadd.xlane.f32.xlu0 %v861_v30  ;;  %v804_v22 = vsel %vm197_vm0, %v3104_v26, 0.0  ;;  %v3109_v43 = vpop.eup %2488  ;;  %v782_v30 = vmul.f32 1.442695, %v729_v10 }
 0x2d3   : > { %814 = vadd.xlane.f32.xlu1 %v813_v23  ;;  %v807_v45 = vsel %vm197_vm0, %v3109_v43, 0.0 }
 0x2d5   : > { %v665_v25 = vpop.xlane.xlu1 %664 }
 0x2d6   : > { %v725_v18 = vsub.f32 %v2967_v31, %v665_v25  ;;  %v754_v25 = vmul.f32 1.442695, %v715_v49 }
 0x2d8   : > { %v774_v19 = vmul.f32 1.442695, %v725_v18 }
 0x2da   : > { %2490 = vpow2.f32 %v774_v19  ;;  %2317 = vmatmul.msk.bf16.gmra.mxu0 %vm197_vm0, %v3124_v62 }
 0x2db   : > { %805 = vadd.xlane.f32.xlu1 %v804_v22  ;;  %2492 = vpow2.f32 %v780_v42 }
 0x2dc   : > { %2494 = vpow2.f32 %v784_v28 }
 0x2dd   : > { %v683_v55 = vpop.xlane.xlu1 %682 }
 0x2de   : > { %v731_v4 = vsub.f32 %v3029_v3, %v683_v55  ;;  %v726_v3 = vsub.f32 %v2971_v33, %v3059_v57  ;;  %v772_v33 = vmul.f32 1.442695, %v724_v44 }
 0x2e0   : > { %v3111_v31 = vpop.eup %2490  ;;  %v786_v7 = vmul.f32 1.442695, %v731_v4  ;;  %v776_v53 = vmul.f32 1.442695, %v726_v3 }
 0x2e1   : > { %v855_v34 = vsel %vm197_vm0, %v3111_v31, 0.0  ;;  %v3128_v63 = vpop.eup %2492 }
 0x2e2   : > { %856 = vadd.xlane.f32.xlu0 %v855_v34  ;;  %v864_v32 = vsel %vm197_vm0, %v3128_v63, 0.0  ;;  %v3133_v8 = vpop.eup %2494  ;;  %2496 = vpow2.f32 %v786_v7 }
 0x2e3   : > { %808 = vadd.xlane.f32.xlu1 %v807_v45  ;;  %v870_v12 = vsel %vm197_vm0, %v3133_v8, 0.0  ;;  %2498 = vpow2.f32 %v782_v30 }
 0x2e4   : > { %2500 = vpow2.f32 %v776_v53 }
 0x2e5   : > { %2502 = vpow2.f32 %v754_v25 }
 0x2e6   : > { %2504 = vpow2.f32 %v772_v33 }
 0x2e8   : > { %v3139_v23 = vpop.eup %2496 }
 0x2e9   : > { %v873_v13 = vsel %vm197_vm0, %v3139_v23, 0.0  ;;  %v3145_v54 = vpop.eup %2498 }
 0x2ea   : > { %v867_v15 = vsel %vm197_vm0, %v3145_v54, 0.0  ;;  %v3153_v57 = vpop.eup %2500 }
 0x2eb   : > { %865 = vadd.xlane.f32.xlu1 %v864_v32  ;;  %v858_v18 = vsel %vm197_vm0, %v3153_v57, 0.0  ;;  %v2503_v19 = vpop.eup %2502 }
 0x2ec   : > { %v3157_v46 = vpop.eup %2504  ;;  %v825_v36 = vsel %vm197_vm0, %v2503_v19, 0.0 }
 0x2ed   : > { %v852_v27 = vsel %vm197_vm0, %v3157_v46, 0.0 }
 0x2f3   : > { %871 = vadd.xlane.f32.xlu1 %v870_v12 }
 0x2fb   : > { %874 = vadd.xlane.f32.xlu1 %v873_v13 }
 0x303   : > { %868 = vadd.xlane.f32.xlu1 %v867_v15 }
 0x30b   : > { %859 = vadd.xlane.f32.xlu1 %v858_v18 }
 0x313   : > { %853 = vadd.xlane.f32.xlu1 %v852_v27 }
 0x314   : > { %826 = vadd.xlane.f32.xlu2 %v825_v36  ;;  %v2448_v9 = vpop.trf.xlu2 }
 0x315   : > { %2322 = vmatmul.msk.bf16.vlgmr.msrb.gmra.mxu0 %vm363_vm1, %v2448_v9 }
 0x31c   : > { %v2449_v21 = vpop.trf.xlu2 }
 0x31d   : > { %2330 = vmatmul.msk.bf16.vlgmr.msrb.gmra.mxu1 %vm363_vm1, %v2449_v21 }
 0x324   : > { %v2450_v22 = vpop.trf.xlu2 }
 0x325   : > { %2323 = vmatmul.msk.bf16.gmra.mxu0 %vm363_vm1, %v2450_v22 }
 0x326   : > { %v824_v34 = vpop.xlane.xlu1 %823 }
 0x327   : > { %v3166_v41 = vpop.f32.mrf.mxu0  ;;  %2506 = vrcp.f32 %v824_v34 }
 0x32c   : > { %v2451_v38 = vpop.trf.xlu2 }
 0x32d   : > { %2331 = vmatmul.msk.bf16.gmra.mxu1 %vm363_vm1, %v2451_v38  ;;  %v2507_v9 = vpop.eup %2506 }
 0x32e   : > { %v818_v50 = vpop.xlane.xlu1 %817  ;;  %v938_v21 = vmul.f32 %v2507_v9, %v3037_v39 }
 0x32f   : > { %v3169_v45 = vpop.f32.mrf.mxu0 }
 0x334   : > { %v2452_v42 = vpop.trf.xlu2 }
 0x335   : > { %2324 = vmatmul.msk.bf16.vlgmr.msra.gmra.mxu2 %vm363_vm1, %v2452_v42 }
 0x336   : > { %v821_v58 = vpop.xlane.xlu1 %820 }
 0x337   : > { %v288_v56 = vpop.f32.mrf.mxu0  ;;  %2508 = vrcp.f32 %v821_v58 }
 0x338   : > { %v329_v60 = vpack.c.bf16 %v288_v56, %v288_v56  ;;  %2510 = vrcp.f32 %v818_v50  ;;  %v970_v56 = vpack.c.bf16 %v938_v21, %v938_v21 }
 0x33a   : > { %v3174_v0 = vunpack.c.l.b16 %v329_v60  ;;  %v1015_v58 = vunpack.c.l.b16 %v970_v56 }
 0x33c   : > { %v2453_v48 = vpop.trf.xlu2 }
 0x33d   : > { %2332 = vmatmul.msk.bf16.gmra.mxu1 %vm363_vm1, %v2453_v48  ;;  %v2509_v22 = vpop.eup %2508 }
 0x33e   : > { %v812_v32 = vpop.xlane.xlu1 %811  ;;  %v2511_v38 = vpop.eup %2510  ;;  %v937_v60 = vmul.f32 %v2509_v22, %v3061_v59 }
 0x33f   : > { %v290_v55 = vpop.f32.mrf.mxu0  ;;  %v936_v34 = vmul.f32 %v2511_v38, %v3054_v37 }
 0x340   : > { %v330_v1 = vpack.c.bf16 %v290_v55, %v290_v55  ;;  %v969_v50 = vpack.c.bf16 %v937_v60, %v937_v60 }
 0x342   : > { %v3176_v4 = vunpack.c.l.b16 %v330_v1 }
 0x344   : > { %v2454_v51 = vpop.trf.xlu2  ;;  %v1054_v6 = vpack.c.b16 %v3176_v4, %v3174_v0 }
 0x345   : > { %2325 = vmatmul.msk.bf16.gmra.mxu2 %vm363_vm1, %v2454_v51 }
 0x346   : > { %v815_v12 = vpop.xlane.xlu1 %814 }
 0x347   : > { %v3180_v7 = vpop.f32.mrf.mxu0 }
 0x34c   : > { %v2455_v28 = vpop.trf.xlu2 }
 0x34d   : > { %2333 = vmatmul.msk.bf16.gmra.mxu1 %vm363_vm1, %v2455_v28 }
 0x34e   : > { %v806_v3 = vpop.xlane.xlu1 %805 }
 0x34f   : > { %v3182_v10 = vpop.f32.mrf.mxu0 }
 0x356   : > { %v809_v25 = vpop.xlane.xlu1 %808 }
 0x357   : > { %v298_v30 = vpop.f32.mrf.mxu0 }
 0x358   : > { %v333_v13 = vpack.c.bf16 %v298_v30, %v298_v30 }
 0x35a   : > { %v3184_v49 = vunpack.c.l.b16 %v333_v13  ;;  %v968_v13 = vpack.c.bf16 %v936_v34, %v936_v34 }
 0x35e   : > { %v866_v18 = vpop.xlane.xlu1 %865 }
 0x35f   : > { %v300_v53 = vpop.f32.mrf.mxu0 }
 0x360   : > { %v334_v44 = vpack.c.bf16 %v300_v53, %v300_v53  ;;  %v1014_v53 = vunpack.c.l.b16 %v969_v50 }
 0x362   : > { %v3186_v15 = vunpack.c.l.b16 %v334_v44 }
 0x364   : > { %v1162_v33 = vpack.c.b16 %v3186_v15, %v3184_v49 }
 0x366   : > { %v872_v27 = vpop.xlane.xlu1 %871 }
 0x36e   : > { %v875_v48 = vpop.xlane.xlu1 %874 }
 0x376   : > { %v869_v59 = vpop.xlane.xlu1 %868 }
 0x37e   : > { %v860_v60 = vpop.xlane.xlu1 %859 }
 0x387   : > { %v827_v36 = vpop.xlane.xlu2 %826 }
 0x388   : > { %2512 = vrcp.f32 %v827_v36 }
 0x389   : > { %2514 = vrcp.f32 %v815_v12 }
 0x38a   : > { %2516 = vrcp.f32 %v812_v32  ;;  %v1013_v32 = vunpack.c.l.b16 %v968_v13 }
 0x38b   : > { %2518 = vrcp.f32 %v809_v25 }
 0x38c   : > { %2520 = vrcp.f32 %v875_v48  ;;  %v1019_v44 = vpack.c.b16 %v1014_v53, %v1013_v32 }
 0x38d   : > { %2522 = vrcp.f32 %v806_v3 }
 0x38e   : > { %v2513_v42 = vpop.eup %2512  ;;  %2524 = vrcp.f32 %v872_v27 }
 0x38f   : > { %v939_v51 = vmul.f32 %v2513_v42, %v2503_v19  ;;  %v2515_v1 = vpop.eup %2514  ;;  %2526 = vrcp.f32 %v869_v59  ;;  %v1031_v42 = vsel %vm197_vm0, %v1019_v44, 0  ;;  %v854_v59 = vpop.xlane.xlu1 %853 }
 0x390   : > { %v2517_v39 = vpop.eup %2516  ;;  %v935_v19 = vmul.f32 %v2515_v1, %v3084_v11  ;;  %2528 = vrcp.f32 %v866_v18  ;;  %v863_v1 = vpop.xlane.xlu0 %862 }
 0x391   : > { %v971_v28 = vpack.c.bf16 %v939_v51, %v939_v51  ;;  %v934_v37 = vmul.f32 %v2517_v39, %v3077_v5  ;;  %v2519_v9 = vpop.eup %2518  ;;  %2530 = vrcp.f32 %v860_v60 }
 0x392   : > { %v967_v36 = vpack.c.bf16 %v935_v19, %v935_v19  ;;  %v2521_v21 = vpop.eup %2520  ;;  %v933_v11 = vmul.f32 %v2519_v9, %v3109_v43  ;;  %2532 = vrcp.f32 %v863_v1  ;;  %v328_v9 = vpack.c.bf16 %v3169_v45, %v3169_v45 }
 0x393   : > { %v1016_v55 = vunpack.c.l.b16 %v971_v28  ;;  %v966_v22 = vpack.c.bf16 %v934_v37, %v934_v37  ;;  %v2523_v38 = vpop.eup %2522  ;;  %v955_v3 = vmul.f32 %v2521_v21, %v3139_v23  ;;  %2534 = vrcp.f32 %v854_v59 }
 0x394   : > { %v2525_v25 = vpop.eup %2524  ;;  %v1012_v48 = vunpack.c.l.b16 %v967_v36  ;;  %v932_v51 = vmul.f32 %v2523_v38, %v3104_v26  ;;  %v965_v34 = vpack.c.bf16 %v933_v11, %v933_v11  ;;  %v327_v36 = vpack.c.bf16 %v3166_v41, %v3166_v41 }
 0x395   : > { %v1020_v30 = vpack.c.b16 %v1016_v55, %v1015_v58  ;;  %v1011_v5 = vunpack.c.l.b16 %v966_v22  ;;  %v954_v56 = vmul.f32 %v2525_v25, %v3133_v8  ;;  %v987_v58 = vpack.c.bf16 %v955_v3, %v955_v3  ;;  %v2527_v55 = vpop.eup %2526 }
 0x396   : > { %v964_v50 = vpack.c.bf16 %v932_v51, %v932_v51  ;;  %v2529_v43 = vpop.eup %2528  ;;  %v1010_v18 = vunpack.c.l.b16 %v965_v34  ;;  %v953_v39 = vmul.f32 %v2527_v55, %v3145_v54  ;;  %v999_v11 = vunpack.c.l.b16 %v328_v9 }
 0x397   : > { %v1034_v12 = vsel %vm197_vm0, %v1020_v30, 0  ;;  %v1018_v28 = vpack.c.b16 %v1012_v48, %v1011_v5  ;;  %v986_v30 = vpack.c.bf16 %v954_v56, %v954_v56  ;;  %v1124_v13 = vunpack.c.l.b16 %v987_v58  ;;  %v2531_v44 = vpop.eup %2530 }
 0x398   : > { %1040 = vmatpush.bf16.xpose.msrb.mxu2 %v1034_v12  ;;  %v1009_v26 = vunpack.c.l.b16 %v964_v50  ;;  %v952_v12 = vmul.f32 %v2529_v43, %v3128_v63  ;;  %v985_v37 = vpack.c.bf16 %v953_v39, %v953_v39  ;;  %v857_v21 = vpop.xlane.xlu0 %856  ;;  %v2533_v22 = vpop.eup %2532  ;;  %v998_v48 = vunpack.c.l.b16 %v327_v36 }
 0x399   : > { %v1028_v23 = vsel %vm197_vm0, %v1018_v28, 0  ;;  %v1123_v8 = vunpack.c.l.b16 %v986_v30  ;;  %2536 = vrcp.f32 %v857_v21  ;;  %v951_v3 = vmul.f32 %v2533_v22, %v3086_v40  ;;  %v2535_v51 = vpop.eup %2534 }
 0x39a   : > { %v3199_v27 = vpop.f32.mrf.mxu1  ;;  %v1017_v19 = vpack.c.b16 %v1010_v18, %v1009_v26  ;;  %v984_v54 = vpack.c.bf16 %v952_v12, %v952_v12  ;;  %v1122_v25 = vunpack.c.l.b16 %v985_v37  ;;  %v1000_v56 = vpack.c.b16 %v999_v11, %v998_v48  ;;  %v2344_v48 = vld [vmem:[%s2863_s25 + $0x70] sm:$0xff]  ;;  %v2345_v11 = vld [vmem:[%s2863_s25 + $0x78] sm:$0xff] }
 0x39b   : > { %v1128_v32 = vpack.c.b16 %v1124_v13, %v1123_v8  ;;  %v983_v28 = vpack.c.bf16 %v951_v3, %v951_v3  ;;  %v948_v50 = vmul.f32 %v2535_v51, %v3157_v46  ;;  %v331_v46 = vpack.c.bf16 %v3180_v7, %v3180_v7 }
 0x39c   : > { %v1025_v38 = vsel %vm197_vm0, %v1017_v19, 0  ;;  %v1121_v41 = vunpack.c.l.b16 %v984_v54 }
 0x39d   : > { %v1142_v63 = vsel %vm197_vm0, %v1128_v32, 0  ;;  %v1120_v1 = vunpack.c.l.b16 %v983_v28  ;;  %v980_v43 = vpack.c.bf16 %v948_v50, %v948_v50  ;;  %v1106_v9 = vunpack.c.l.b16 %v331_v46  ;;  %v2343_v28 = vld [vmem:[%s2863_s25 + $0x68] sm:$0xff] }
 0x39e   : > { %v1127_v45 = vpack.c.b16 %v1122_v25, %v1121_v41  ;;  %v1232_v41 = vpack.c.bf16 %v2345_v11, %v2344_v48 }
 0x39f   : > { %v2537_v34 = vpop.eup %2536  ;;  %v1117_v8 = vunpack.c.l.b16 %v980_v43  ;;  %v2338_v43 = vld [vmem:[%s2863_s25 + $0x40] sm:$0xff] }
 0x3a0   : > { %1041 = vmatpush.bf16.xpose.msrb.mxu2 %v1031_v42  ;;  %v950_v42 = vmul.f32 %v2531_v44, %v3153_v57  ;;  %v1139_v57 = vsel %vm197_vm0, %v1127_v45, 0  ;;  %v949_v40 = vmul.f32 %v2537_v34, %v3111_v31  ;;  %v332_v31 = vpack.c.bf16 %v3182_v10, %v3182_v10  ;;  %v2340_v34 = vld [vmem:[%s2863_s25 + $0x50] sm:$0xff] }
 0x3a2   : > { %v3206_v53 = vpop.f32.mrf.mxu1  ;;  %v982_v5 = vpack.c.bf16 %v950_v42, %v950_v42  ;;  %v981_v18 = vpack.c.bf16 %v949_v40, %v949_v40  ;;  %v1107_v7 = vunpack.c.l.b16 %v332_v31 }
 0x3a4   : > { %v1119_v55 = vunpack.c.l.b16 %v982_v5  ;;  %v1118_v12 = vunpack.c.l.b16 %v981_v18  ;;  %v1108_v21 = vpack.c.b16 %v1107_v7, %v1106_v9  ;;  %v2339_v18 = vld [vmem:[%s2863_s25 + $0x48] sm:$0xff] }
 0x3a6   : > { %v1126_v30 = vpack.c.b16 %v1120_v1, %v1119_v55  ;;  %v1125_v19 = vpack.c.b16 %v1118_v12, %v1117_v8  ;;  %v2341_v55 = vld [vmem:[%s2863_s25 + $0x58] sm:$0xff] }
 0x3a7   : > { %v1230_v50 = vpack.c.bf16 %v2341_v55, %v2340_v34 }
 0x3a8   : > { %1042 = vmatpush.bf16.xpose.msrb.mxu2 %v1028_v23  ;;  %v3224_v23 = vpop.f32.mrf.mxu0  ;;  %v1136_v26 = vsel %vm197_vm0, %v1126_v30, 0  ;;  %v1133_v32 = vsel %vm197_vm0, %v1125_v19, 0 }
 0x3a9   : > { %v636_v40 = vsel %vm197_vm0, %v3224_v23, -inf }
 0x3aa   : > { %v3216_v60 = vpop.f32.mrf.mxu1 }
 0x3ab   : > { %v690_v19 = vsel %vm197_vm0, %v3216_v60, -inf }
 0x3b0   : > { %1043 = vmatpush.bf16.xpose.msrb.mxu2 %v1025_v38  ;;  %v3240_v44 = vpop.f32.mrf.mxu0 }
 0x3b1   : > { %v639_v12 = vsel %vm197_vm0, %v3240_v44, -inf }
 0x3b2   : > { %v3226_v13 = vpop.f32.mrf.mxu1 }
 0x3b3   : > { %v693_v31 = vsel %vm197_vm0, %v3226_v13, -inf }
 0x3b7   : > { %2334 = vmatmul.msk.bf16.vlgmr.msrb.gmra.mxu2 %vm197_vm0, %v1000_v56  ;;  %v2342_v56 = vld [vmem:[%s2863_s25 + $0x60] sm:$0xff]  ;;  %s137_s25 = sand.u32 1, %s2784_s10  }
 0x3b8   : > { %1148 = vmatpush.bf16.xpose.msra.mxu2 %v1142_v63  ;;  %v3219_v58 = vpop.f32.mrf.mxu2  ;;  %v3251_v38 = vpop.f32.mrf.mxu0  ;;  %s2302_s16 = sshll.u32 %s137_s25, 7  ;;  %s2220_s13 = scalar_lea.sflag [#allocation3], %s137_s25 }
 0x3b9   : > { %v648_v22 = vsel %vm197_vm0, %v3219_v58, -inf  ;;  %v642_v42 = vsel %vm197_vm0, %v3251_v38, -inf  ;;  %s3308_s17 = scalar_lea.vmem [#allocation2], %s2302_s16 }
 0x3ba   : > { %v3242_v36 = vpop.f32.mrf.mxu1  ;;  %s2233_s26 = sshll.u32 %s3308_s17, 4  ;;  %s2234_s26 = int_to_ptr.vmem [resolvable:$true] %s2233_s26 }
 0x3bb   : > { %v696_v8 = vsel %vm197_vm0, %v3242_v36, -inf }
 0x3c0   : > { %1149 = vmatpush.bf16.xpose.msra.mxu2 %v1139_v57  ;;  %v3228_v39 = vpop.f32.mrf.mxu2  ;;  %v3263_v45 = vpop.f32.mrf.mxu0  ;;  %v1231_v57 = vpack.c.bf16 %v2343_v28, %v2342_v56 }
 0x3c1   : > { %v651_v25 = vsel %vm197_vm0, %v3228_v39, -inf  ;;  %v645_v51 = vsel %vm197_vm0, %v3263_v45, -inf }
 0x3c2   : > { %v3253_v63 = vpop.f32.mrf.mxu1 }
 0x3c3   : > { %v699_v46 = vsel %vm197_vm0, %v3253_v63, -inf }
 0x3c8   : > { %1150 = vmatpush.bf16.xpose.msra.mxu2 %v1136_v26  ;;  %v3235_v59 = vpop.f32.mrf.mxu2  ;;  %v1229_v26 = vpack.c.bf16 %v2339_v18, %v2338_v43 }
 0x3c9   : > { %v654_v37 = vsel %vm197_vm0, %v3235_v59, -inf }
 0x3ca   : > { %655 = vmax.xlane.f32.xlu1 %v654_v37  ;;  %v3261_v3 = vpop.f32.mrf.mxu1 }
 0x3cb   : > { %v702_v5 = vsel %vm197_vm0, %v3261_v3, -inf }
 0x3d0   : > { %1151 = vmatpush.bf16.xpose.msra.mxu2 %v1133_v32  ;;  %v3244_v54 = vpop.f32.mrf.mxu2  ;;  %v687_v32 = vsel %vm197_vm0, %v3206_v53, -inf }
 0x3d1   : > { %v657_v10 = vsel %vm197_vm0, %v3244_v54, -inf }
 0x3d2   : > { %658 = vmax.xlane.f32.xlu0 %v657_v10  ;;  %649 = vmax.xlane.f32.xlu1 %v648_v22  ;;  %v3273_v1 = vpop.f32.mrf.mxu1 }
 0x3d3   : > { %v705_v30 = vsel %vm197_vm0, %v3273_v1, -inf }
 0x3d7   : > { %2336 = vmatmul.msk.bf16.vlgmr.msra.gmra.mxu2 %vm197_vm0, %v1108_v21 }
 0x3d8   : > { %1237 = vmatpush.bf16.msrb.mxu2 %v1232_v41 }
 0x3da   : > { %652 = vmax.xlane.f32.xlu0 %v651_v25  ;;  %643 = vmax.xlane.f32.xlu1 %v642_v42 }
 0x3dc   : > { %1238 = vmatpush.bf16.msrb.mxu2 %v1231_v57 }
 0x3e0   : > { %1239 = vmatpush.bf16.msrb.mxu2 %v1230_v50 }
 0x3e2   : > { %703 = vmax.xlane.f32.xlu1 %v702_v5  ;;  %646 = vmax.xlane.f32.xlu0 %v645_v51 }
 0x3e4   : > { %1240 = vmatpush.bf16.msrb.mxu2 %v1229_v26 }
 0x3e7   : > { %2346 = vmatmul.msk.bf16.vlgmr.msrb.gmra.mxu2 %vm197_vm0, %v2879_v14  ;;  %v684_v14 = vsel %vm197_vm0, %v3199_v27, -inf }
 0x3ea   : > { %637 = vmax.xlane.f32.xlu1 %v636_v40  ;;  %706 = vmax.xlane.f32.xlu0 %v705_v30 }
 0x3f2   : > { %697 = vmax.xlane.f32.xlu1 %v696_v8  ;;  %640 = vmax.xlane.f32.xlu0 %v639_v12 }
 0x3f7   : > { %2347 = vmatmul.msk.bf16.gmra.mxu2 %vm197_vm0, %v2889_v17 }
 0x3fa   : > { %691 = vmax.xlane.f32.xlu1 %v690_v19  ;;  %700 = vmax.xlane.f32.xlu0 %v699_v46 }
 0x402   : > { %685 = vmax.xlane.f32.xlu1 %v684_v14  ;;  %694 = vmax.xlane.f32.xlu0 %v693_v31 }
 0x407   : > { %2348 = vmatmul.msk.bf16.gmra.mxu2 %vm197_vm0, %v2899_v20 }
 0x40a   : > { %688 = vmax.xlane.f32.xlu0 %v687_v32 }
 0x417   : > { %2349 = vmatmul.msk.bf16.gmra.mxu2 %vm197_vm0, %v2909_v24 }
 0x427   : > { %2350 = vmatmul.msk.bf16.gmra.mxu2 %vm197_vm0, %v2921_v29 }
 0x437   : > { %2351 = vmatmul.msk.bf16.gmra.mxu2 %vm197_vm0, %v2933_v35 }
 0x43a   : > { %v1045_v17 = vpop.f32.mrf.mxu2 }
 0x43b   : > { %1212 = vst.msk [vmem:[%s3308_s17] sm:$0xff] %vm197_vm0, %v1045_v17 }
 0x43d   : > { %v656_v37 = vpop.xlane.xlu1 %655 }
 0x43e   : > { %v722_v9 = vsub.f32 %v3235_v59, %v656_v37 }
 0x440   : > { %v768_v20 = vmul.f32 1.442695, %v722_v9 }
 0x442   : > { %2538 = vpow2.f32 %v768_v20  ;;  %v1047_v24 = vpop.f32.mrf.mxu2 }
 0x443   : > { %1213 = vst.msk [vmem:[%s3308_s17 + $0x8] sm:$0xff] %vm197_vm0, %v1047_v24 }
 0x445   : > { %v659_v29 = vpop.xlane.xlu0 %658  ;;  %v650_v7 = vpop.xlane.xlu1 %649 }
 0x446   : > { %v723_v21 = vsub.f32 %v3244_v54, %v659_v29  ;;  %v720_v10 = vsub.f32 %v3219_v58, %v650_v7 }
 0x447   : > { %2352 = vmatmul.msk.bf16.gmra.mxu2 %vm197_vm0, %v2943_v52 }
 0x448   : > { %v3319_v22 = vpop.eup %2538  ;;  %v770_v25 = vmul.f32 1.442695, %v723_v21  ;;  %v764_v42 = vmul.f32 1.442695, %v720_v10 }
 0x449   : > { %v846_v59 = vsel %vm197_vm0, %v3319_v22, 0.0 }
 0x44a   : > { %2540 = vpow2.f32 %v770_v25  ;;  %847 = vadd.xlane.f32.xlu2 %v846_v59 }
 0x44b   : > { %2542 = vpow2.f32 %v764_v42 }
 0x44d   : > { %v653_v35 = vpop.xlane.xlu0 %652  ;;  %v644_v48 = vpop.xlane.xlu1 %643 }
 0x44e   : > { %v721_v11 = vsub.f32 %v3228_v39, %v653_v35  ;;  %v718_v41 = vsub.f32 %v3251_v38, %v644_v48 }
 0x450   : > { %v3325_v54 = vpop.eup %2540  ;;  %v766_v58 = vmul.f32 1.442695, %v721_v11  ;;  %v760_v5 = vmul.f32 1.442695, %v718_v41 }
 0x451   : > { %v3329_v51 = vpop.eup %2542  ;;  %v849_v56 = vsel %vm197_vm0, %v3325_v54, 0.0 }
 0x452   : > { %2544 = vpow2.f32 %v766_v58  ;;  %850 = vadd.xlane.f32.xlu1 %v849_v56  ;;  %v840_v28 = vsel %vm197_vm0, %v3329_v51, 0.0 }
 0x453   : > { %2546 = vpow2.f32 %v760_v5  ;;  %841 = vadd.xlane.f32.xlu0 %v840_v28 }
 0x455   : > { %v704_v38 = vpop.xlane.xlu1 %703  ;;  %v647_v34 = vpop.xlane.xlu0 %646 }
 0x456   : > { %v738_v52 = vsub.f32 %v3261_v3, %v704_v38  ;;  %v719_v57 = vsub.f32 %v3263_v45, %v647_v34 }
 0x457   : > { %2353 = vmatmul.msk.bf16.gmra.mxu2 %vm197_vm0, %v3018_v61 }
 0x458   : > { %v3339_v55 = vpop.eup %2544  ;;  %v800_v50 = vmul.f32 1.442695, %v738_v52  ;;  %v762_v40 = vmul.f32 1.442695, %v719_v57 }
 0x459   : > { %v3341_v30 = vpop.eup %2546  ;;  %v843_v43 = vsel %vm197_vm0, %v3339_v55, 0.0 }
 0x45a   : > { %v1153_v39 = vpop.f32.mrf.mxu2  ;;  %2548 = vpow2.f32 %v800_v50  ;;  %844 = vadd.xlane.f32.xlu2 %v843_v43  ;;  %v834_v18 = vsel %vm197_vm0, %v3341_v30, 0.0 }
 0x45b   : > { %1216 = vst.msk [vmem:[%s3308_s17 + $0x20] sm:$0xff] %vm197_vm0, %v1153_v39  ;;  %2550 = vpow2.f32 %v762_v40  ;;  %835 = vadd.xlane.f32.xlu1 %v834_v18 }
 0x45d   : > { %v638_v3 = vpop.xlane.xlu1 %637  ;;  %v707_v45 = vpop.xlane.xlu0 %706 }
 0x45e   : > { %v716_v8 = vsub.f32 %v3224_v23, %v638_v3  ;;  %v739_v12 = vsub.f32 %v3273_v1, %v707_v45 }
 0x460   : > { %v3351_v19 = vpop.eup %2548  ;;  %v756_v46 = vmul.f32 1.442695, %v716_v8  ;;  %v802_v14 = vmul.f32 1.442695, %v739_v12 }
 0x461   : > { %v3355_v31 = vpop.eup %2550  ;;  %v894_v32 = vsel %vm197_vm0, %v3351_v19, 0.0 }
 0x462   : > { %v1155_v26 = vpop.f32.mrf.mxu2  ;;  %2552 = vpow2.f32 %v756_v46  ;;  %895 = vadd.xlane.f32.xlu2 %v894_v32  ;;  %v837_v17 = vsel %vm197_vm0, %v3355_v31, 0.0 }
 0x463   : > { %1217 = vst.msk [vmem:[%s3308_s17 + $0x28] sm:$0xff] %vm197_vm0, %v1155_v26  ;;  %2554 = vpow2.f32 %v802_v14  ;;  %838 = vadd.xlane.f32.xlu0 %v837_v17 }
 0x465   : > { %v698_v23 = vpop.xlane.xlu1 %697  ;;  %v641_v1 = vpop.xlane.xlu0 %640 }
 0x466   : > { %v736_v37 = vsub.f32 %v3242_v36, %v698_v23  ;;  %v717_v9 = vsub.f32 %v3240_v44, %v641_v1 }
 0x467   : > { %2354 = vmatmul.msk.bf16.gmra.mxu2 %vm197_vm0, %v3050_v47 }
 0x468   : > { %v3363_v20 = vpop.eup %2552  ;;  %v796_v61 = vmul.f32 1.442695, %v736_v37  ;;  %v758_v24 = vmul.f32 1.442695, %v717_v9 }
 0x469   : > { %v3365_v29 = vpop.eup %2554  ;;  %v828_v7 = vsel %vm197_vm0, %v3363_v20, 0.0 }
 0x46a   : > { %2556 = vpow2.f32 %v796_v61  ;;  %v897_v21 = vsel %vm197_vm0, %v3365_v29, 0.0  ;;  %v1242_v26 = vpop.f32.mrf.mxu2 }
 0x46b   : > { %2558 = vpow2.f32 %v758_v24  ;;  %829 = vadd.xlane.f32.xlu0 %v828_v7  ;;  %898 = vadd.xlane.f32.xlu1 %v897_v21  ;;  %v1302_v8 = vmul.f32 0.125, %v1242_v26 }
 0x46d   : > { %v692_v10 = vpop.xlane.xlu1 %691  ;;  %v701_v36 = vpop.xlane.xlu0 %700  ;;  %v1310_v32 = vpack.c.bf16 %v1302_v8, %v1302_v8 }
 0x46e   : > { %v734_v44 = vsub.f32 %v3216_v60, %v692_v10  ;;  %v737_v25 = vsub.f32 %v3253_v63, %v701_v36 }
 0x46f   : > { %v1336_v37 = vunpack.c.l.b16 %v1310_v32 }
 0x470   : > { %v3373_v42 = vpop.eup %2556  ;;  %v792_v59 = vmul.f32 1.442695, %v734_v44  ;;  %v798_v35 = vmul.f32 1.442695, %v737_v25 }
 0x471   : > { %v3377_v48 = vpop.eup %2558  ;;  %v888_v11 = vsel %vm197_vm0, %v3373_v42, 0.0 }
 0x472   : > { %2560 = vpow2.f32 %v792_v59  ;;  %v831_v41 = vsel %vm197_vm0, %v3377_v48, 0.0 }
 0x473   : > { %2562 = vpow2.f32 %v798_v35  ;;  %889 = vadd.xlane.f32.xlu1 %v888_v11  ;;  %832 = vadd.xlane.f32.xlu2 %v831_v41 }
 0x475   : > { %v686_v60 = vpop.xlane.xlu1 %685  ;;  %v695_v63 = vpop.xlane.xlu0 %694 }
 0x476   : > { %v732_v58 = vsub.f32 %v3199_v27, %v686_v60  ;;  %v735_v5 = vsub.f32 %v3226_v13, %v695_v63 }
 0x477   : > { %2355 = vmatmul.msk.bf16.gmra.mxu2 %vm197_vm0, %v3072_v2  ;;  %v1244_v2 = vpop.f32.mrf.mxu2 }
 0x478   : > { %v3385_v56 = vpop.eup %2560  ;;  %v788_v47 = vmul.f32 1.442695, %v732_v58  ;;  %v794_v28 = vmul.f32 1.442695, %v735_v5  ;;  %v1303_v12 = vmul.f32 0.125, %v1244_v2 }
 0x479   : > { %v3387_v39 = vpop.eup %2562  ;;  %v882_v38 = vsel %vm197_vm0, %v3385_v56, 0.0 }
 0x47a   : > { %2564 = vpow2.f32 %v788_v47  ;;  %v891_v34 = vsel %vm197_vm0, %v3387_v39, 0.0  ;;  %v1311_v17 = vpack.c.bf16 %v1303_v12, %v1303_v12 }
 0x47b   : > { %2566 = vpow2.f32 %v794_v28  ;;  %883 = vadd.xlane.f32.xlu2 %v882_v38  ;;  %892 = vadd.xlane.f32.xlu0 %v891_v34 }
 0x47c   : > { %v1337_v9 = vunpack.c.l.b16 %v1311_v17 }
 0x47d   : > { %v689_v52 = vpop.xlane.xlu0 %688 }
 0x47e   : > { %v733_v27 = vsub.f32 %v3206_v53, %v689_v52  ;;  %v1338_v7 = vpack.c.b16 %v1337_v9, %v1336_v37 }
 0x47f   : > { %v1247_v3 = vpop.f32.mrf.mxu2 }
 0x480   : > { %v3394_v13 = vpop.eup %2564  ;;  %v790_v57 = vmul.f32 1.442695, %v733_v27  ;;  %v1304_v46 = vmul.f32 0.125, %v1247_v3 }
 0x481   : > { %v3398_v50 = vpop.eup %2566  ;;  %v876_v40 = vsel %vm197_vm0, %v3394_v13, 0.0 }
 0x482   : > { %2568 = vpow2.f32 %v790_v57  ;;  %v885_v43 = vsel %vm197_vm0, %v3398_v50, 0.0  ;;  %v1312_v23 = vpack.c.bf16 %v1304_v46, %v1304_v46 }
 0x483   : > { %877 = vadd.xlane.f32.xlu0 %v876_v40  ;;  %886 = vadd.xlane.f32.xlu1 %v885_v43 }
 0x484   : > { %v1405_v61 = vunpack.c.l.b16 %v1312_v23 }
 0x487   : > { %2356 = vmatmul.msk.bf16.gmra.mxu2 %vm197_vm0, %v3099_v16  ;;  %v1249_v45 = vpop.f32.mrf.mxu2 }
 0x488   : > { %v3404_v18 = vpop.eup %2568  ;;  %v1305_v14 = vmul.f32 0.125, %v1249_v45 }
 0x489   : > { %v879_v53 = vsel %vm197_vm0, %v3404_v18, 0.0 }
 0x48a   : > { %880 = vadd.xlane.f32.xlu2 %v879_v53  ;;  %v1313_v1 = vpack.c.bf16 %v1305_v14, %v1305_v14 }
 0x48c   : > { %v1406_v24 = vunpack.c.l.b16 %v1313_v1 }
 0x48e   : > { %v1407_v16 = vpack.c.b16 %v1406_v24, %v1405_v61 }
 0x48f   : > { %v1252_v10 = vpop.f32.mrf.mxu2 }
 0x490   : > { %v1306_v28 = vmul.f32 0.125, %v1252_v10 }
 0x497   : > { %2357 = vmatmul.msk.bf16.gmra.mxu2 %vm197_vm0, %v3124_v62  ;;  %v1254_v36 = vpop.f32.mrf.mxu2 }
 0x498   : > { %v1307_v38 = vmul.f32 0.125, %v1254_v36 }
 0x49a   : > { %v1315_v43 = vpack.c.bf16 %v1307_v38, %v1307_v38 }
 0x49c   : > { %v1475_v17 = vunpack.c.l.b16 %v1315_v43 }
 0x49f   : > { %v1257_v63 = vpop.f32.mrf.mxu2 }
 0x4a0   : > { %v1308_v34 = vmul.f32 0.125, %v1257_v63 }
 0x4a2   : > { %v1316_v26 = vpack.c.bf16 %v1308_v34, %v1308_v34 }
 0x4a7   : > { %v1259_v45 = vpop.f32.mrf.mxu2 }
 0x4a8   : > { %v1309_v12 = vmul.f32 0.125, %v1259_v45 }
 0x4aa   : > { %v1317_v23 = vpack.c.bf16 %v1309_v12, %v1309_v12 }
 0x4ac   : > { %v1544_v61 = vunpack.c.l.b16 %v1317_v23 }
 0x4af   : > { %v1262_v23 = vpop.f32.mrf.mxu2 }
 0x4bd   : > { %2456 = vxpose.binary.xlu1.c.b16.start.end [1/2] (short) (narrow) %v1407_v16, %v1338_v7, 64  ;;  %v848_v21 = vpop.xlane.xlu2 %847 }
 0x4be   : > { %2570 = vrcp.f32 %v848_v21 }
 0x4c4   : > { %v2571_v44 = vpop.eup %2570 }
 0x4c5   : > { %v851_v62 = vpop.xlane.xlu1 %850  ;;  %v946_v59 = vmul.f32 %v2571_v44, %v3319_v22  ;;  %v1314_v22 = vpack.c.bf16 %v1306_v28, %v1306_v28 }
 0x4c6   : > { %2572 = vrcp.f32 %v851_v62  ;;  %v842_v25 = vpop.xlane.xlu0 %841 }
 0x4c7   : > { %2574 = vrcp.f32 %v842_v25  ;;  %v978_v60 = vpack.c.bf16 %v946_v59, %v946_v59  ;;  %v1474_v14 = vunpack.c.l.b16 %v1314_v22 }
 0x4c9   : > { %v1069_v52 = vunpack.c.l.b16 %v978_v60  ;;  %v1476_v7 = vpack.c.b16 %v1475_v17, %v1474_v14 }
 0x4cc   : > { %v2573_v35 = vpop.eup %2572 }
 0x4cd   : > { %v845_v11 = vpop.xlane.xlu2 %844  ;;  %v947_v41 = vmul.f32 %v2573_v35, %v3325_v54  ;;  %v2575_v58 = vpop.eup %2574 }
 0x4ce   : > { %2576 = vrcp.f32 %v845_v11  ;;  %v836_v5 = vpop.xlane.xlu1 %835  ;;  %v944_v57 = vmul.f32 %v2575_v58, %v3329_v51  ;;  %v1543_v51 = vunpack.c.l.b16 %v1316_v26 }
 0x4cf   : > { %v979_v47 = vpack.c.bf16 %v947_v41, %v947_v41  ;;  %2578 = vrcp.f32 %v836_v5 }
 0x4d0   : > { %v976_v3 = vpack.c.bf16 %v944_v57, %v944_v57 }
 0x4d1   : > { %v1070_v27 = vunpack.c.l.b16 %v979_v47 }
 0x4d2   : > { %v1067_v1 = vunpack.c.l.b16 %v976_v3 }
 0x4d3   : > { %v1074_v40 = vpack.c.b16 %v1070_v27, %v1069_v52 }
 0x4d4   : > { %v2577_v53 = vpop.eup %2576 }
 0x4d5   : > { %v1088_v54 = vsel %vm197_vm0, %v1074_v40, 0  ;;  %v945_v2 = vmul.f32 %v2577_v53, %v3339_v55  ;;  %v2579_v46 = vpop.eup %2578  ;;  %v1545_v55 = vpack.c.b16 %v1544_v61, %v1543_v51  ;;  %v896_v10 = vpop.xlane.xlu2 %895 }
 0x4d6   : > { %v839_v8 = vpop.xlane.xlu0 %838  ;;  %1094 = vmatpush.bf16.xpose.msrb.mxu3 %v1088_v54  ;;  %v942_v9 = vmul.f32 %v2579_v46, %v3341_v30 }
 0x4d7   : > { %2580 = vrcp.f32 %v839_v8  ;;  %v977_v32 = vpack.c.bf16 %v945_v2, %v945_v2  ;;  %2465 = vxpose.binary.xlu0.c.b16.start.end [1/2] (short) (narrow) %v1545_v55, %v1476_v7, 64 }
 0x4d8   : > { %v974_v44 = vpack.c.bf16 %v942_v9, %v942_v9 }
 0x4d9   : > { %v1068_v37 = vunpack.c.l.b16 %v977_v32 }
 0x4da   : > { %v1065_v30 = vunpack.c.l.b16 %v974_v44 }
 0x4db   : > { %v1073_v24 = vpack.c.b16 %v1068_v37, %v1067_v1 }
 0x4dd   : > { %v2581_v16 = vpop.eup %2580  ;;  %v1085_v21 = vsel %vm197_vm0, %v1073_v24, 0 }
 0x4de   : > { %v899_v62 = vpop.xlane.xlu1 %898  ;;  %1095 = vmatpush.bf16.xpose.msrb.mxu3 %v1085_v21  ;;  %v943_v36 = vmul.f32 %v2581_v16, %v3355_v31  ;;  %v830_v25 = vpop.xlane.xlu0 %829 }
 0x4df   : > { %2582 = vrcp.f32 %v899_v62  ;;  %v1264_v62 = vpop.f32.mrf.mxu2 }
 0x4e0   : > { %v975_v59 = vpack.c.bf16 %v943_v36, %v943_v36  ;;  %2584 = vrcp.f32 %v896_v10  ;;  %v1319_v0 = vpack.c.bf16 %v1264_v62, %v1264_v62 }
 0x4e1   : > { %2586 = vrcp.f32 %v830_v25 }
 0x4e2   : > { %v1066_v35 = vunpack.c.l.b16 %v975_v59 }
 0x4e4   : > { %v1072_v11 = vpack.c.b16 %v1066_v35, %v1065_v30 }
 0x4e5   : > { %v2583_v41 = vpop.eup %2582 }
 0x4e6   : > { %v833_v60 = vpop.xlane.xlu2 %832  ;;  %v1082_v63 = vsel %vm197_vm0, %v1072_v11, 0  ;;  %v2585_v58 = vpop.eup %2584  ;;  %v963_v31 = vmul.f32 %v2583_v41, %v3365_v29  ;;  %v1318_v11 = vpack.c.bf16 %v1262_v23, %v1262_v23 }
 0x4e7   : > { %v890_v5 = vpop.xlane.xlu1 %889  ;;  %1096 = vmatpush.bf16.xpose.msrb.mxu3 %v1082_v63  ;;  %v2587_v47 = vpop.eup %2586  ;;  %2588 = vrcp.f32 %v833_v60  ;;  %v962_v28 = vmul.f32 %v2585_v58, %v3351_v19  ;;  %v1359_v58 = vunpack.c.l.b16 %v1319_v0 }
 0x4e8   : > { %2590 = vrcp.f32 %v890_v5  ;;  %v940_v38 = vmul.f32 %v2587_v47, %v3363_v20  ;;  %v995_v34 = vpack.c.bf16 %v963_v31, %v963_v31  ;;  %v1358_v63 = vunpack.c.l.b16 %v1318_v11 }
 0x4e9   : > { %v994_v40 = vpack.c.bf16 %v962_v28, %v962_v28 }
 0x4ea   : > { %v972_v43 = vpack.c.bf16 %v940_v38, %v940_v38  ;;  %v1178_v26 = vunpack.c.l.b16 %v995_v34  ;;  %v1360_v31 = vpack.c.b16 %v1359_v58, %v1358_v63 }
 0x4eb   : > { %v1177_v29 = vunpack.c.l.b16 %v994_v40 }
 0x4ec   : > { %v1063_v2 = vunpack.c.l.b16 %v972_v43 }
 0x4ed   : > { %v2589_v52 = vpop.eup %2588  ;;  %v1182_v45 = vpack.c.b16 %v1178_v26, %v1177_v29 }
 0x4ee   : > { %v884_v27 = vpop.xlane.xlu2 %883  ;;  %v893_v57 = vpop.xlane.xlu0 %892  ;;  %v941_v22 = vmul.f32 %v2589_v52, %v3377_v48 }
 0x4ef   : > { %v2591_v53 = vpop.eup %2590  ;;  %2592 = vrcp.f32 %v893_v57  ;;  %v1196_v51 = vsel %vm197_vm0, %v1182_v45, 0 }
 0x4f0   : > { %2594 = vrcp.f32 %v884_v27  ;;  %v973_v54 = vpack.c.bf16 %v941_v22, %v941_v22  ;;  %v960_v19 = vmul.f32 %v2591_v53, %v3373_v42 }
 0x4f2   : > { %v1064_v3 = vunpack.c.l.b16 %v973_v54  ;;  %v992_v17 = vpack.c.bf16 %v960_v19, %v960_v19 }
 0x4f4   : > { %v1071_v20 = vpack.c.b16 %v1064_v3, %v1063_v2  ;;  %v1175_v37 = vunpack.c.l.b16 %v992_v17 }
 0x4f5   : > { %v2593_v8 = vpop.eup %2592 }
 0x4f6   : > { %v887_v12 = vpop.xlane.xlu1 %886  ;;  %v878_v46 = vpop.xlane.xlu0 %877  ;;  %v1079_v48 = vsel %vm197_vm0, %v1071_v20, 0  ;;  %v961_v32 = vmul.f32 %v2593_v8, %v3387_v39 }
 0x4f7   : > { %v2595_v14 = vpop.eup %2594  ;;  %2596 = vrcp.f32 %v887_v12  ;;  %1097 = vmatpush.bf16.xpose.msrb.mxu3 %v1079_v48 }
 0x4f8   : > { %2598 = vrcp.f32 %v878_v46  ;;  %v993_v1 = vpack.c.bf16 %v961_v32, %v961_v32  ;;  %v958_v42 = vmul.f32 %v2595_v14, %v3385_v56 }
 0x4fa   : > { %v1176_v9 = vunpack.c.l.b16 %v993_v1  ;;  %v990_v39 = vpack.c.bf16 %v958_v42, %v958_v42 }
 0x4fc   : > { %v1181_v7 = vpack.c.b16 %v1176_v9, %v1175_v37  ;;  %v1173_v36 = vunpack.c.l.b16 %v990_v39 }
 0x4fd   : > { %v2597_v61 = vpop.eup %2596  ;;  %v881_v24 = vpop.xlane.xlu2 %880 }
 0x4fe   : > { %v2599_v55 = vpop.eup %2598  ;;  %2600 = vrcp.f32 %v881_v24  ;;  %v959_v16 = vmul.f32 %v2597_v61, %v3398_v50  ;;  %2335 = vmatmul.msk.bf16.vlgmr.msrb.gmra.mxu3 %vm197_vm0, %v1054_v6  ;;  %v1193_v21 = vsel %vm197_vm0, %v1181_v7, 0  ;;  %v1267_v6 = vpop.f32.mrf.mxu2 }
 0x4ff   : > { %1202 = vmatpush.bf16.xpose.msra.mxu3 %v1196_v51  ;;  %v956_v56 = vmul.f32 %v2599_v55, %v3394_v13  ;;  %v1320_v13 = vpack.c.bf16 %v1267_v6, %v1267_v6 }
 0x500   : > { %v991_v10 = vpack.c.bf16 %v959_v16, %v959_v16 }
 0x501   : > { %v988_v50 = vpack.c.bf16 %v956_v56, %v956_v56 }
 0x502   : > { %v1174_v44 = vunpack.c.l.b16 %v991_v10 }
 0x503   : > { %v1171_v41 = vunpack.c.l.b16 %v988_v50 }
 0x504   : > { %v2601_v25 = vpop.eup %2600  ;;  %v1180_v59 = vpack.c.b16 %v1174_v44, %v1173_v36 }
 0x505   : > { %v957_v30 = vmul.f32 %v2601_v25, %v3404_v18  ;;  %v1427_v18 = vunpack.c.l.b16 %v1320_v13 }
 0x506   : > { %v1190_v35 = vsel %vm197_vm0, %v1180_v59, 0  ;;  %v1269_v28 = vpop.f32.mrf.mxu2 }
 0x507   : > { %1203 = vmatpush.bf16.xpose.msra.mxu3 %v1193_v21  ;;  %v989_v4 = vpack.c.bf16 %v957_v30, %v957_v30  ;;  %v1321_v38 = vpack.c.bf16 %v1269_v28, %v1269_v28 }
 0x509   : > { %v1172_v60 = vunpack.c.l.b16 %v989_v4  ;;  %v1428_v34 = vunpack.c.l.b16 %v1321_v38 }
 0x50b   : > { %v1179_v5 = vpack.c.b16 %v1172_v60, %v1171_v41  ;;  %v1429_v52 = vpack.c.b16 %v1428_v34, %v1427_v18 }
 0x50d   : > { %v1187_v47 = vsel %vm197_vm0, %v1179_v5, 0  ;;  %1450 = vmatpush.bf16.msra.mxu1 %v1429_v52 }
 0x50e   : > { %v1272_v40 = vpop.f32.mrf.mxu2 }
 0x50f   : > { %1204 = vmatpush.bf16.xpose.msra.mxu3 %v1190_v35  ;;  %v1322_v43 = vpack.c.bf16 %v1272_v40, %v1272_v40 }
 0x511   : > { %v1496_v26 = vunpack.c.l.b16 %v1322_v43 }
 0x516   : > { %v1274_v53 = vpop.f32.mrf.mxu2 }
 0x517   : > { %1205 = vmatpush.bf16.xpose.msra.mxu3 %v1187_v47  ;;  %v1323_v54 = vpack.c.bf16 %v1274_v53, %v1274_v53 }
 0x519   : > { %v1497_v29 = vunpack.c.l.b16 %v1323_v54 }
 0x51b   : > { %v1498_v15 = vpack.c.b16 %v1497_v29, %v1496_v26 }
 0x51e   : > { %2337 = vmatmul.msk.bf16.vlgmr.msra.gmra.mxu3 %vm197_vm0, %v1162_v33  ;;  %v1277_v19 = vpop.f32.mrf.mxu2 }
 0x51f   : > { %1381 = vmatpush.bf16.msrb.mxu3 %v1360_v31  ;;  %v1324_v45 = vpack.c.bf16 %v1277_v19, %v1277_v19 }
 0x521   : > { %v1565_v12 = vunpack.c.l.b16 %v1324_v45 }
 0x523   : > { %1519 = vmatpush.bf16.msra.mxu3 %v1498_v15 }
 0x526   : > { %v1279_v8 = vpop.f32.mrf.mxu2 }
 0x527   : > { %v1325_v46 = vpack.c.bf16 %v1279_v8, %v1279_v8 }
 0x529   : > { %v1566_v14 = vunpack.c.l.b16 %v1325_v46 }
 0x52b   : > { %v1567_v48 = vpack.c.b16 %v1566_v14, %v1565_v12 }
 0x52d   : > { %1588 = vmatpush.bf16.msrb.mxu1 %v1567_v48 }
 0x569   : > { %v2457_v27 = vpop.trf.xlu1 }
 0x56a   : > { %2358 = vmatmul.msk.bf16.vlgmr.msrb.gmra.mxu3 %vm363_vm1, %v2457_v27 }
 0x571   : > { %v2458_v57 = vpop.trf.xlu1 }
 0x572   : > { %2362 = vmatmul.msk.bf16.vlgmr.msra.gmra.mxu1 %vm363_vm1, %v2458_v57 }
 0x579   : > { %v2459_v22 = vpop.trf.xlu1 }
 0x57a   : > { %2359 = vmatmul.msk.bf16.gmra.mxu3 %vm363_vm1, %v2459_v22 }
 0x581   : > { %v2460_v49 = vpop.trf.xlu1  ;;  %v1099_v33 = vpop.f32.mrf.mxu3 }
 0x582   : > { %2363 = vmatmul.msk.bf16.gmra.mxu1 %vm363_vm1, %v2460_v49  ;;  %1214 = vst.msk [vmem:[%s3308_s17 + $0x10] sm:$0xff] %vm197_vm0, %v1099_v33 }
 0x583   : > { %v2466_v51 = vpop.trf.xlu0 }
 0x589   : > { %v2461_v2 = vpop.trf.xlu1  ;;  %v1101_v3 = vpop.f32.mrf.mxu3 }
 0x58a   : > { %2360 = vmatmul.msk.bf16.gmra.mxu3 %vm363_vm1, %v2461_v2  ;;  %1215 = vst.msk [vmem:[%s3308_s17 + $0x18] sm:$0xff] %vm197_vm0, %v1101_v3 }
 0x58b   : > { %v2467_v42 = vpop.trf.xlu0 }
 0x591   : > { %v2462_v20 = vpop.trf.xlu1 }
 0x592   : > { %2364 = vmatmul.msk.bf16.gmra.mxu1 %vm363_vm1, %v2462_v20 }
 0x593   : > { %v2468_v37 = vpop.trf.xlu0 }
 0x599   : > { %v2463_v32 = vpop.trf.xlu1 }
 0x59a   : > { %2361 = vmatmul.msk.bf16.gmra.mxu3 %vm363_vm1, %v2463_v32 }
 0x59b   : > { %v2469_v9 = vpop.trf.xlu0 }
 0x5a1   : > { %v1207_v17 = vpop.f32.mrf.mxu3  ;;  %v2464_v23 = vpop.trf.xlu1 }
 0x5a2   : > { %1218 = vst.msk [vmem:[%s3308_s17 + $0x30] sm:$0xff] %vm197_vm0, %v1207_v17  ;;  %2365 = vmatmul.msk.bf16.gmra.mxu1 %vm363_vm1, %v2464_v23 }
 0x5a3   : > { %v2470_v61 = vpop.trf.xlu0 }
 0x5a9   : > { %v1209_v1 = vpop.f32.mrf.mxu3 }
 0x5aa   : > { %1219 = vst.msk [vmem:[%s3308_s17 + $0x38] sm:$0xff] %vm197_vm0, %v1209_v1  ;;  %2366 = vmatmul.msk.bf16.vlgmr.msra.gmra.mxu3 %vm363_vm1, %v2466_v51 }
 0x5ab   : > { %v2471_v24 = vpop.trf.xlu0 }
 0x5b2   : > { %2370 = vmatmul.msk.bf16.vlgmr.msrb.gmra.mxu1 %vm363_vm1, %v2467_v42 }
 0x5b3   : > { %v2472_v7 = vpop.trf.xlu0 }
 0x5ba   : > { %2367 = vmatmul.msk.bf16.gmra.mxu3 %vm363_vm1, %v2468_v37 }
 0x5bb   : > { %v2473_v11 = vpop.trf.xlu0 }
 0x5c2   : > { %2371 = vmatmul.msk.bf16.gmra.mxu1 %vm363_vm1, %v2469_v9 }
 0x5ca   : > { %2368 = vmatmul.msk.bf16.gmra.mxu3 %vm363_vm1, %v2470_v61 }
 0x5d2   : > { %2372 = vmatmul.msk.bf16.gmra.mxu1 %vm363_vm1, %v2471_v24 }
 0x5da   : > { %2369 = vmatmul.msk.bf16.gmra.mxu3 %vm363_vm1, %v2472_v7 }
 0x5e2   : > { %2373 = vmatmul.msk.bf16.gmra.mxu1 %vm363_vm1, %v2473_v11 }
 0x5ed   : > { %v3467_v55 = vpop.f32.mrf.mxu3 }
 0x5ee   : > { %v1610_v16 = vsel %vm197_vm0, %v3467_v55, -inf }
 0x5ef   : > { %v3471_v39 = vpop.f32.mrf.mxu1  ;;  %1611 = vmax.xlane.f32.xlu2 %v1610_v16 }
 0x5f0   : > { %v1634_v44 = vsel %vm197_vm0, %v3471_v39, -inf }
 0x5f5   : > { %v3473_v21 = vpop.f32.mrf.mxu3 }
 0x5f6   : > { %v1613_v10 = vsel %vm197_vm0, %v3473_v21, -inf }
 0x5f7   : > { %v3477_v62 = vpop.f32.mrf.mxu1  ;;  %1614 = vmax.xlane.f32.xlu2 %v1613_v10 }
 0x5f8   : > { %v1637_v56 = vsel %vm197_vm0, %v3477_v62, -inf }
 0x5f9   : > { %1638 = vmax.xlane.f32.xlu0 %v1637_v56 }
 0x5fd   : > { %v3481_v36 = vpop.f32.mrf.mxu3 }
 0x5fe   : > { %v1616_v59 = vsel %vm197_vm0, %v3481_v36, -inf }
 0x5ff   : > { %v3485_v25 = vpop.f32.mrf.mxu1  ;;  %1635 = vmax.xlane.f32.xlu2 %v1634_v44 }
 0x600   : > { %v1640_v41 = vsel %vm197_vm0, %v3485_v25, -inf }
 0x605   : > { %v3489_v30 = vpop.f32.mrf.mxu3 }
 0x606   : > { %v1619_v0 = vsel %vm197_vm0, %v3489_v30, -inf }
 0x607   : > { %v3491_v50 = vpop.f32.mrf.mxu1  ;;  %1617 = vmax.xlane.f32.xlu2 %v1616_v59 }
 0x608   : > { %v1643_v31 = vsel %vm197_vm0, %v3491_v50, -inf }
 0x60d   : > { %v3493_v35 = vpop.f32.mrf.mxu3 }
 0x60e   : > { %v1622_v63 = vsel %vm197_vm0, %v3493_v35, -inf }
 0x60f   : > { %v3498_v4 = vpop.f32.mrf.mxu1  ;;  %1620 = vmax.xlane.f32.xlu2 %v1619_v0 }
 0x610   : > { %v1646_v52 = vsel %vm197_vm0, %v3498_v4, -inf }
 0x615   : > { %v3500_v6 = vpop.f32.mrf.mxu3 }
 0x616   : > { %v1625_v18 = vsel %vm197_vm0, %v3500_v6, -inf }
 0x617   : > { %v3504_v60 = vpop.f32.mrf.mxu1  ;;  %1641 = vmax.xlane.f32.xlu2 %v1640_v41 }
 0x618   : > { %v1649_v26 = vsel %vm197_vm0, %v3504_v60, -inf }
 0x61d   : > { %v3508_v58 = vpop.f32.mrf.mxu3 }
 0x61e   : > { %v1628_v40 = vsel %vm197_vm0, %v3508_v58, -inf }
 0x61f   : > { %v3510_v5 = vpop.f32.mrf.mxu1  ;;  %1623 = vmax.xlane.f32.xlu2 %v1622_v63 }
 0x620   : > { %v1652_v13 = vsel %vm197_vm0, %v3510_v5, -inf }
 0x621   : > { %1653 = vmax.xlane.f32.xlu1 %v1652_v13 }
 0x625   : > { %v3514_v47 = vpop.f32.mrf.mxu3 }
 0x626   : > { %v1631_v29 = vsel %vm197_vm0, %v3514_v47, -inf }
 0x627   : > { %1644 = vmax.xlane.f32.xlu2 %v1643_v31  ;;  %v3522_v38 = vpop.f32.mrf.mxu1 }
 0x628   : > { %v1655_v2 = vsel %vm197_vm0, %v3522_v38, -inf }
 0x62d   : > { %v3518_v28 = vpop.f32.mrf.mxu3 }
 0x62e   : > { %v1658_v49 = vsel %vm197_vm0, %v3518_v28, -inf }
 0x62f   : > { %1626 = vmax.xlane.f32.xlu2 %v1625_v18  ;;  %v3530_v57 = vpop.f32.mrf.mxu1 }
 0x630   : > { %v1682_v22 = vsel %vm197_vm0, %v3530_v57, -inf }
 0x635   : > { %v3524_v34 = vpop.f32.mrf.mxu3 }
 0x636   : > { %v1661_v27 = vsel %vm197_vm0, %v3524_v34, -inf }
 0x637   : > { %1647 = vmax.xlane.f32.xlu2 %v1646_v52  ;;  %1662 = vmax.xlane.f32.xlu1 %v1661_v27  ;;  %v3562_v12 = vpop.f32.mrf.mxu1 }
 0x638   : > { %v1685_v48 = vsel %vm197_vm0, %v3562_v12, -inf }
 0x63d   : > { %v3536_v43 = vpop.f32.mrf.mxu3 }
 0x63e   : > { %v1664_v19 = vsel %vm197_vm0, %v3536_v43, -inf }
 0x63f   : > { %1629 = vmax.xlane.f32.xlu2 %v1628_v40  ;;  %1683 = vmax.xlane.f32.xlu1 %v1682_v22  ;;  %v3576_v37 = vpop.f32.mrf.mxu1 }
 0x640   : > { %v1688_v61 = vsel %vm197_vm0, %v3576_v37, -inf }
 0x645   : > { %v3538_v53 = vpop.f32.mrf.mxu3 }
 0x646   : > { %v1667_v51 = vsel %vm197_vm0, %v3538_v53, -inf }
 0x647   : > { %1650 = vmax.xlane.f32.xlu2 %v1649_v26  ;;  %v3587_v44 = vpop.f32.mrf.mxu1 }
 0x648   : > { %v1691_v41 = vsel %vm197_vm0, %v3587_v44, -inf }
 0x64d   : > { %v3542_v54 = vpop.f32.mrf.mxu3 }
 0x64e   : > { %v1670_v16 = vsel %vm197_vm0, %v3542_v54, -inf }
 0x64f   : > { %1632 = vmax.xlane.f32.xlu2 %v1631_v29  ;;  %v3604_v52 = vpop.f32.mrf.mxu1 }
 0x650   : > { %v1694_v27 = vsel %vm197_vm0, %v3604_v52, -inf }
 0x655   : > { %v3548_v15 = vpop.f32.mrf.mxu3 }
 0x657   : > { %1659 = vmax.xlane.f32.xlu2 %v1658_v49  ;;  %v3611_v49 = vpop.f32.mrf.mxu1 }
 0x65d   : > { %v3550_v33 = vpop.f32.mrf.mxu3 }
 0x65e   : > { %v1676_v26 = vsel %vm197_vm0, %v3550_v33, -inf }
 0x65f   : > { %1656 = vmax.xlane.f32.xlu2 %v1655_v2 }
 0x662   : > { %v3554_v3 = vpop.xlane.xlu2 %1611 }
 0x665   : > { %v3558_v45 = vpop.f32.mrf.mxu3 }
 0x666   : > { %v1679_v20 = vsel %vm197_vm0, %v3558_v45, -inf }
 0x667   : > { %1665 = vmax.xlane.f32.xlu2 %v1664_v19  ;;  %1680 = vmax.xlane.f32.xlu0 %v1679_v20 }
 0x66a   : > { %v1615_v8 = vpop.xlane.xlu2 %1614 }
 0x66b   : > { %v1707_v46 = vsub.f32 %v3473_v21, %v1615_v8 }
 0x66d   : > { %v1740_v14 = vmul.f32 1.442695, %v1707_v46  ;;  %v1697_v46 = vsel %vm197_vm0, %v3611_v49, -inf }
 0x66f   : > { %2602 = vpow2.f32 %v1740_v14  ;;  %1686 = vmax.xlane.f32.xlu2 %v1685_v48  ;;  %v3620_v14 = vpop.f32.mrf.mxu1 }
 0x672   : > { %v3567_v32 = vpop.xlane.xlu2 %1635 }
 0x675   : > { %v3569_v17 = vpop.eup %2602 }
 0x676   : > { %v1805_v23 = vsel %vm197_vm0, %v3569_v17, 0.0 }
 0x677   : > { %1668 = vmax.xlane.f32.xlu2 %v1667_v51  ;;  %1806 = vadd.xlane.f32.xlu0 %v1805_v23 }
 0x67a   : > { %v1618_v1 = vpop.xlane.xlu2 %1617 }
 0x67b   : > { %v1708_v42 = vsub.f32 %v3481_v36, %v1618_v1  ;;  %v1706_v1 = vsub.f32 %v3467_v55, %v3554_v3 }
 0x67d   : > { %v1742_v9 = vmul.f32 1.442695, %v1708_v42 }
 0x67f   : > { %2604 = vpow2.f32 %v1742_v9  ;;  %1689 = vmax.xlane.f32.xlu2 %v1688_v61  ;;  %v1738_v61 = vmul.f32 1.442695, %v1706_v1 }
 0x682   : > { %v1621_v24 = vpop.xlane.xlu2 %1620 }
 0x683   : > { %v1709_v7 = vsub.f32 %v3489_v30, %v1621_v24 }
 0x685   : > { %v3583_v21 = vpop.eup %2604  ;;  %v1744_v10 = vmul.f32 1.442695, %v1709_v7  ;;  %v3631_v7 = vpop.f32.mrf.mxu1 }
 0x686   : > { %v1808_v56 = vsel %vm197_vm0, %v3583_v21, 0.0 }
 0x687   : > { %2606 = vpow2.f32 %v1744_v10  ;;  %1671 = vmax.xlane.f32.xlu2 %v1670_v16  ;;  %1809 = vadd.xlane.f32.xlu0 %v1808_v56  ;;  %v1703_v10 = vsel %vm197_vm0, %v3631_v7, -inf }
 0x68a   : > { %v1642_v36 = vpop.xlane.xlu2 %1641 }
 0x68b   : > { %v1716_v59 = vsub.f32 %v3485_v25, %v1642_v36  ;;  %v1673_v25 = vsel %vm197_vm0, %v3548_v15, -inf }
 0x68d   : > { %v3590_v11 = vpop.eup %2606  ;;  %v1758_v30 = vmul.f32 1.442695, %v1716_v59 }
 0x68e   : > { %v1811_v0 = vsel %vm197_vm0, %v3590_v11, 0.0 }
 0x68f   : > { %2608 = vpow2.f32 %v1758_v30  ;;  %1812 = vadd.xlane.f32.xlu1 %v1811_v0  ;;  %1692 = vmax.xlane.f32.xlu2 %v1691_v41 }
 0x692   : > { %v1624_v63 = vpop.xlane.xlu2 %1623 }
 0x693   : > { %v1710_v16 = vsub.f32 %v3493_v35, %v1624_v63 }
 0x694   : > { %v1654_v63 = vpop.xlane.xlu1 %1653 }
 0x695   : > { %v3596_v13 = vpop.eup %2608  ;;  %v1746_v3 = vmul.f32 1.442695, %v1710_v16 }
 0x696   : > { %v1832_v31 = vsel %vm197_vm0, %v3596_v13, 0.0 }
 0x697   : > { %1833 = vadd.xlane.f32.xlu1 %v1832_v31  ;;  %1674 = vmax.xlane.f32.xlu2 %v1673_v25 }
 0x69a   : > { %v3602_v18 = vpop.xlane.xlu2 %1644 }
 0x69f   : > { %1695 = vmax.xlane.f32.xlu2 %v1694_v27 }
 0x6a2   : > { %v1627_v40 = vpop.xlane.xlu2 %1626 }
 0x6a3   : > { %v1711_v22 = vsub.f32 %v3500_v6, %v1627_v40  ;;  %v1720_v40 = vsub.f32 %v3510_v5, %v1654_v63 }
 0x6a5   : > { %v1748_v29 = vmul.f32 1.442695, %v1711_v22  ;;  %v1766_v22 = vmul.f32 1.442695, %v1720_v40 }
 0x6a7   : > { %2610 = vpow2.f32 %v1748_v29  ;;  %1677 = vmax.xlane.f32.xlu2 %v1676_v26  ;;  %v3657_v26 = vpop.xlane.xlu0 %1638 }
 0x6aa   : > { %v1648_v2 = vpop.xlane.xlu2 %1647 }
 0x6ab   : > { %v1718_v19 = vsub.f32 %v3498_v4, %v1648_v2  ;;  %v1700_v4 = vsel %vm197_vm0, %v3620_v14, -inf }
 0x6ad   : > { %v3614_v20 = vpop.eup %2610  ;;  %v1762_v8 = vmul.f32 1.442695, %v1718_v19 }
 0x6ae   : > { %v1817_v6 = vsel %vm197_vm0, %v3614_v20, 0.0 }
 0x6af   : > { %2612 = vpow2.f32 %v1762_v8  ;;  %1698 = vmax.xlane.f32.xlu2 %v1697_v46  ;;  %1818 = vadd.xlane.f32.xlu0 %v1817_v6 }
 0x6b2   : > { %v1630_v48 = vpop.xlane.xlu2 %1629 }
 0x6b3   : > { %v1712_v51 = vsub.f32 %v3508_v58, %v1630_v48 }
 0x6b5   : > { %v3625_v23 = vpop.eup %2612  ;;  %v1750_v42 = vmul.f32 1.442695, %v1712_v51 }
 0x6b6   : > { %v1838_v9 = vsel %vm197_vm0, %v3625_v23, 0.0 }
 0x6b7   : > { %2614 = vpow2.f32 %v1750_v42  ;;  %1839 = vadd.xlane.f32.xlu1 %v1838_v9  ;;  %1701 = vmax.xlane.f32.xlu2 %v1700_v4 }
 0x6b8   : > { %2616 = vpow2.f32 %v1738_v61 }
 0x6b9   : > { %2618 = vpow2.f32 %v1746_v3 }
 0x6ba   : > { %v1651_v24 = vpop.xlane.xlu2 %1650 }
 0x6bb   : > { %v1719_v30 = vsub.f32 %v3504_v60, %v1651_v24 }
 0x6bd   : > { %v3633_v58 = vpop.eup %2614  ;;  %v1764_v41 = vmul.f32 1.442695, %v1719_v30 }
 0x6be   : > { %v1820_v55 = vsel %vm197_vm0, %v3633_v58, 0.0  ;;  %v3640_v36 = vpop.eup %2616 }
 0x6bf   : > { %1704 = vmax.xlane.f32.xlu2 %v1703_v10  ;;  %1821 = vadd.xlane.f32.xlu0 %v1820_v55  ;;  %v1802_v35 = vsel %vm197_vm0, %v3640_v36, 0.0  ;;  %v3648_v25 = vpop.eup %2618 }
 0x6c2   : > { %v1633_v56 = vpop.xlane.xlu2 %1632 }
 0x6c3   : > { %v1713_v59 = vsub.f32 %v3514_v47, %v1633_v56  ;;  %v1814_v47 = vsel %vm197_vm0, %v3648_v25, 0.0 }
 0x6c5   : > { %v1752_v0 = vmul.f32 1.442695, %v1713_v59 }
 0x6c7   : > { %2620 = vpow2.f32 %v1752_v0  ;;  %1803 = vadd.xlane.f32.xlu2 %v1802_v35 }
 0x6c8   : > { %2622 = vpow2.f32 %v1764_v41 }
 0x6c9   : > { %2624 = vpow2.f32 %v1766_v22 }
 0x6ca   : > { %v3646_v31 = vpop.xlane.xlu2 %1659 }
 0x6cd   : > { %v3650_v27 = vpop.eup %2620 }
 0x6ce   : > { %v1823_v60 = vsel %vm197_vm0, %v3650_v27, 0.0  ;;  %v3659_v2 = vpop.eup %2622 }
 0x6cf   : > { %1824 = vadd.xlane.f32.xlu1 %v1823_v60  ;;  %1815 = vadd.xlane.f32.xlu2 %v1814_v47  ;;  %v1841_v5 = vsel %vm197_vm0, %v3659_v2, 0.0  ;;  %v3664_v48 = vpop.eup %2624 }
 0x6d2   : > { %v1657_v29 = vpop.xlane.xlu2 %1656 }
 0x6d3   : > { %v1721_v19 = vsub.f32 %v3522_v38, %v1657_v29  ;;  %v1844_v38 = vsel %vm197_vm0, %v3664_v48, 0.0 }
 0x6d5   : > { %v1768_v8 = vmul.f32 1.442695, %v1721_v19 }
 0x6d7   : > { %2626 = vpow2.f32 %v1768_v8  ;;  %1842 = vadd.xlane.f32.xlu2 %v1841_v5 }
 0x6da   : > { %v1666_v46 = vpop.xlane.xlu2 %1665  ;;  %v1681_v6 = vpop.xlane.xlu0 %1680 }
 0x6db   : > { %v1724_v51 = vsub.f32 %v3536_v43, %v1666_v46  ;;  %v1729_v42 = vsub.f32 %v3558_v45, %v1681_v6 }
 0x6dd   : > { %v3667_v4 = vpop.eup %2626  ;;  %v1774_v1 = vmul.f32 1.442695, %v1724_v51  ;;  %v1784_v61 = vmul.f32 1.442695, %v1729_v42 }
 0x6de   : > { %v1847_v9 = vsel %vm197_vm0, %v3667_v4, 0.0 }
 0x6df   : > { %2628 = vpow2.f32 %v1774_v1  ;;  %1845 = vadd.xlane.f32.xlu2 %v1844_v38  ;;  %1848 = vadd.xlane.f32.xlu0 %v1847_v9 }
 0x6e0   : > { %2630 = vpow2.f32 %v1784_v61 }
 0x6e2   : > { %v3674_v24 = vpop.xlane.xlu2 %1686 }
 0x6e5   : > { %v3676_v16 = vpop.eup %2628 }
 0x6e6   : > { %v1856_v43 = vsel %vm197_vm0, %v3676_v16, 0.0  ;;  %v3680_v10 = vpop.eup %2630 }
 0x6e7   : > { %1857 = vadd.xlane.f32.xlu2 %v1856_v43  ;;  %v1871_v56 = vsel %vm197_vm0, %v3680_v10, 0.0 }
 0x6ea   : > { %v1669_v45 = vpop.xlane.xlu2 %1668 }
 0x6eb   : > { %v1725_v55 = vsub.f32 %v3538_v53, %v1669_v45  ;;  %v3707_v45 = vpop.xlane.xlu0 %1806 }
 0x6ed   : > { %v1776_v3 = vmul.f32 1.442695, %v1725_v55 }
 0x6ef   : > { %2632 = vpow2.f32 %v1776_v3  ;;  %1872 = vadd.xlane.f32.xlu2 %v1871_v56 }
 0x6f2   : > { %v1690_v59 = vpop.xlane.xlu2 %1689 }
 0x6f3   : > { %v1732_v46 = vsub.f32 %v3576_v37, %v1690_v59 }
 0x6f5   : > { %v3685_v30 = vpop.eup %2632  ;;  %v1790_v1 = vmul.f32 1.442695, %v1732_v46 }
 0x6f6   : > { %v1859_v0 = vsel %vm197_vm0, %v3685_v30, 0.0 }
 0x6f7   : > { %1860 = vadd.xlane.f32.xlu0 %v1859_v0 }
 0x6fa   : > { %v1672_v35 = vpop.xlane.xlu2 %1671 }
 0x6fb   : > { %v1726_v41 = vsub.f32 %v3542_v54, %v1672_v35  ;;  %v1663_v54 = vpop.xlane.xlu1 %1662 }
 0x6fc   : > { %v1723_v9 = vsub.f32 %v3524_v34, %v1663_v54 }
 0x6fd   : > { %v1778_v63 = vmul.f32 1.442695, %v1726_v41 }
 0x6fe   : > { %v1772_v43 = vmul.f32 1.442695, %v1723_v9 }
 0x6ff   : > { %2634 = vpow2.f32 %v1778_v63 }
 0x702   : > { %v1693_v40 = vpop.xlane.xlu2 %1692 }
 0x703   : > { %v1684_v37 = vpop.xlane.xlu1 %1683 }
 0x704   : > { %v1730_v34 = vsub.f32 %v3530_v57, %v1684_v37 }
 0x705   : > { %v3690_v53 = vpop.eup %2634 }
 0x706   : > { %v1862_v60 = vsel %vm197_vm0, %v3690_v53, 0.0  ;;  %v1786_v63 = vmul.f32 1.442695, %v1730_v34  ;;  %v1731_v34 = vsub.f32 %v3562_v12, %v3674_v24  ;;  %v1715_v12 = vsub.f32 %v3477_v62, %v3657_v26 }
 0x707   : > { %1863 = vadd.xlane.f32.xlu0 %v1862_v60  ;;  %v3721_v60 = vpop.xlane.xlu0 %1809 }
 0x70a   : > { %v1675_v47 = vpop.xlane.xlu2 %1674 }
 0x70b   : > { %v1727_v22 = vsub.f32 %v3548_v15, %v1675_v47  ;;  %v3719_v41 = vpop.xlane.xlu1 %1812 }
 0x70d   : > { %v1780_v29 = vmul.f32 1.442695, %v1727_v22 }
 0x70f   : > { %2636 = vpow2.f32 %v1780_v29  ;;  %v1733_v29 = vsub.f32 %v3587_v44, %v1693_v40  ;;  %v1714_v44 = vsub.f32 %v3471_v39, %v3567_v32  ;;  %v1722_v32 = vsub.f32 %v3518_v28, %v3646_v31 }
 0x711   : > { %v1792_v46 = vmul.f32 1.442695, %v1733_v29  ;;  %v1754_v37 = vmul.f32 1.442695, %v1714_v44 }
 0x712   : > { %v1696_v19 = vpop.xlane.xlu2 %1695 }
 0x713   : > { %v1734_v8 = vsub.f32 %v3604_v52, %v1696_v19 }
 0x715   : > { %v3696_v5 = vpop.eup %2636  ;;  %v1794_v6 = vmul.f32 1.442695, %v1734_v8 }
 0x716   : > { %v1865_v51 = vsel %vm197_vm0, %v3696_v5, 0.0 }
 0x717   : > { %2638 = vpow2.f32 %v1794_v6  ;;  %1866 = vadd.xlane.f32.xlu1 %v1865_v51  ;;  %v3733_v6 = vpop.xlane.xlu1 %1833 }
 0x718   : > { %2640 = vpow2.f32 %v1790_v1 }
 0x71a   : > { %v1678_v42 = vpop.xlane.xlu2 %1677 }
 0x71b   : > { %v1728_v15 = vsub.f32 %v3550_v33, %v1678_v42  ;;  %v1717_v42 = vsub.f32 %v3491_v50, %v3602_v18 }
 0x71d   : > { %v3702_v38 = vpop.eup %2638  ;;  %v1782_v52 = vmul.f32 1.442695, %v1728_v15  ;;  %v1760_v39 = vmul.f32 1.442695, %v1717_v42 }
 0x71e   : > { %v1886_v61 = vsel %vm197_vm0, %v3702_v38, 0.0  ;;  %v3709_v3 = vpop.eup %2640 }
 0x71f   : > { %2642 = vpow2.f32 %v1782_v52  ;;  %1887 = vadd.xlane.f32.xlu0 %v1886_v61  ;;  %v1880_v35 = vsel %vm197_vm0, %v3709_v3, 0.0 }
 0x720   : > { %2644 = vpow2.f32 %v1772_v43 }
 0x722   : > { %v1699_v55 = vpop.xlane.xlu2 %1698  ;;  %v1819_v51 = vpop.xlane.xlu0 %1818 }
 0x723   : > { %v1735_v33 = vsub.f32 %v3611_v49, %v1699_v55 }
 0x725   : > { %v3712_v56 = vpop.eup %2642  ;;  %v1796_v59 = vmul.f32 1.442695, %v1735_v33  ;;  %v1770_v33 = vmul.f32 1.442695, %v1722_v32 }
 0x726   : > { %v1868_v0 = vsel %vm197_vm0, %v3712_v56, 0.0  ;;  %v3723_v47 = vpop.eup %2644 }
 0x727   : > { %2646 = vpow2.f32 %v1796_v59  ;;  %1869 = vadd.xlane.f32.xlu1 %v1868_v0  ;;  %1881 = vadd.xlane.f32.xlu0 %v1880_v35  ;;  %v1853_v54 = vsel %vm197_vm0, %v3723_v47, 0.0  ;;  %v1788_v0 = vmul.f32 1.442695, %v1731_v34 }
 0x728   : > { %2648 = vpow2.f32 %v1786_v63 }
 0x72a   : > { %v1702_v49 = vpop.xlane.xlu2 %1701 }
 0x72b   : > { %v1736_v57 = vsub.f32 %v3620_v14, %v1702_v49 }
 0x72d   : > { %v3726_v22 = vpop.eup %2646  ;;  %v1798_v19 = vmul.f32 1.442695, %v1736_v57 }
 0x72e   : > { %v1889_v8 = vsel %vm197_vm0, %v3726_v22, 0.0  ;;  %v3735_v1 = vpop.eup %2648 }
 0x72f   : > { %2650 = vpow2.f32 %v1798_v19  ;;  %1890 = vadd.xlane.f32.xlu1 %v1889_v8  ;;  %1854 = vadd.xlane.f32.xlu0 %v1853_v54  ;;  %v1874_v61 = vsel %vm197_vm0, %v3735_v1, 0.0 }
 0x730   : > { %2652 = vpow2.f32 %v1792_v46 }
 0x732   : > { %v1705_v14 = vpop.xlane.xlu2 %1704  ;;  %v1822_v50 = vpop.xlane.xlu0 %1821 }
 0x733   : > { %v1737_v40 = vsub.f32 %v3631_v7, %v1705_v14  ;;  %v3750_v7 = vpop.xlane.xlu1 %1839 }
 0x735   : > { %v3742_v15 = vpop.eup %2650  ;;  %v1800_v9 = vmul.f32 1.442695, %v1737_v40 }
 0x736   : > { %v1892_v52 = vsel %vm197_vm0, %v3742_v15, 0.0  ;;  %v3752_v43 = vpop.eup %2652 }
 0x737   : > { %2654 = vpow2.f32 %v1800_v9  ;;  %1893 = vadd.xlane.f32.xlu1 %v1892_v52  ;;  %1875 = vadd.xlane.f32.xlu0 %v1874_v61  ;;  %v1883_v59 = vsel %vm197_vm0, %v3752_v43, 0.0 }
 0x738   : > { %2656 = vpow2.f32 %v1754_v37 }
 0x739   : > { %2658 = vpow2.f32 %v1760_v39 }
 0x73a   : > { %v1804_v18 = vpop.xlane.xlu2 %1803  ;;  %2660 = vrcp.f32 %v1822_v50 }
 0x73b   : > { %2662 = vpow2.f32 %v1770_v33 }
 0x73c   : > { %2664 = vrcp.f32 %v1819_v51  ;;  %v1756_v51 = vmul.f32 1.442695, %v1715_v12 }
 0x73d   : > { %v3754_v55 = vpop.eup %2654 }
 0x73e   : > { %v1895_v28 = vsel %vm197_vm0, %v3754_v55, 0.0  ;;  %v3762_v31 = vpop.eup %2656 }
 0x73f   : > { %1884 = vadd.xlane.f32.xlu1 %v1883_v59  ;;  %1896 = vadd.xlane.f32.xlu2 %v1895_v28  ;;  %v3764_v35 = vpop.eup %2658  ;;  %v1826_v29 = vsel %vm197_vm0, %v3762_v31, 0.0 }
 0x740   : > { %v2661_v57 = vpop.eup %2660  ;;  %v1835_v19 = vsel %vm197_vm0, %v3764_v35, 0.0 }
 0x741   : > { %v1936_v24 = vmul.f32 %v2661_v57, %v3633_v58  ;;  %v3773_v8 = vpop.eup %2662 }
 0x742   : > { %v1825_v63 = vpop.xlane.xlu1 %1824  ;;  %v1816_v49 = vpop.xlane.xlu2 %1815  ;;  %v1850_v52 = vsel %vm197_vm0, %v3773_v8, 0.0 }
 0x743   : > { %2666 = vrcp.f32 %v1825_v63  ;;  %v2665_v54 = vpop.eup %2664  ;;  %v1968_v58 = vpack.c.bf16 %v1936_v24, %v1936_v24 }
 0x744   : > { %2668 = vrcp.f32 %v1816_v49  ;;  %v1935_v9 = vmul.f32 %v2665_v54, %v3614_v20 }
 0x745   : > { %2670 = vpow2.f32 %v1788_v0  ;;  %v2013_v61 = vunpack.c.l.b16 %v1968_v58 }
 0x746   : > { %2672 = vrcp.f32 %v3719_v41 }
 0x747   : > { %1827 = vadd.xlane.f32.xlu1 %v1826_v29  ;;  %1836 = vadd.xlane.f32.xlu2 %v1835_v19  ;;  %2674 = vrcp.f32 %v3721_v60  ;;  %v1967_v60 = vpack.c.bf16 %v1935_v9, %v1935_v9 }
 0x748   : > { %2676 = vpow2.f32 %v1756_v51 }
 0x749   : > { %v2667_v46 = vpop.eup %2666  ;;  %2678 = vrcp.f32 %v1804_v18  ;;  %v2012_v0 = vunpack.c.l.b16 %v1967_v60 }
 0x74a   : > { %v2669_v14 = vpop.eup %2668  ;;  %v1937_v62 = vmul.f32 %v2667_v46, %v3650_v27  ;;  %v1843_v26 = vpop.xlane.xlu2 %1842  ;;  %2680 = vrcp.f32 %v3707_v45 }
 0x74b   : > { %v3777_v44 = vpop.eup %2670  ;;  %v1934_v40 = vmul.f32 %v2669_v14, %v3648_v25 }
 0x74c   : > { %v1969_v42 = vpack.c.bf16 %v1937_v62, %v1937_v62  ;;  %v1877_v41 = vsel %vm197_vm0, %v3777_v44, 0.0  ;;  %v2673_v39 = vpop.eup %2672 }
 0x74d   : > { %v1966_v37 = vpack.c.bf16 %v1934_v40, %v1934_v40  ;;  %v2675_v50 = vpop.eup %2674  ;;  %v1933_v59 = vmul.f32 %v2673_v39, %v3590_v11 }
 0x74e   : > { %v2014_v27 = vunpack.c.l.b16 %v1969_v42  ;;  %v3789_v28 = vpop.eup %2676  ;;  %v1932_v63 = vmul.f32 %v2675_v50, %v3583_v21 }
 0x74f   : > { %1878 = vadd.xlane.f32.xlu1 %v1877_v41  ;;  %1851 = vadd.xlane.f32.xlu2 %v1850_v52  ;;  %v2011_v34 = vunpack.c.l.b16 %v1966_v37  ;;  %v1829_v18 = vsel %vm197_vm0, %v3789_v28, 0.0  ;;  %v1965_v45 = vpack.c.bf16 %v1933_v59, %v1933_v59  ;;  %v2679_v57 = vpop.eup %2678 }
 0x750   : > { %v2018_v32 = vpack.c.b16 %v2014_v27, %v2013_v61  ;;  %v2681_v12 = vpop.eup %2680  ;;  %v1964_v24 = vpack.c.bf16 %v1932_v63, %v1932_v63  ;;  %v1930_v46 = vmul.f32 %v2679_v57, %v3640_v36 }
 0x751   : > { %v2017_v49 = vpack.c.b16 %v2012_v0, %v2011_v34  ;;  %v2010_v54 = vunpack.c.l.b16 %v1965_v45  ;;  %v1931_v62 = vmul.f32 %v2681_v12, %v3569_v17 }
 0x752   : > { %v1846_v20 = vpop.xlane.xlu2 %1845  ;;  %v1849_v25 = vpop.xlane.xlu0 %1848  ;;  %v2032_v33 = vsel %vm197_vm0, %v2018_v32, 0  ;;  %v2009_v14 = vunpack.c.l.b16 %v1964_v24  ;;  %v1962_v40 = vpack.c.bf16 %v1930_v46, %v1930_v46 }
 0x753   : > { %2682 = vrcp.f32 %v1846_v20  ;;  %2038 = vmatpush.bf16.xpose.msra.mxu0 %v2032_v33  ;;  %v2029_v11 = vsel %vm197_vm0, %v2017_v49, 0  ;;  %v1963_v52 = vpack.c.bf16 %v1931_v62, %v1931_v62 }
 0x754   : > { %2684 = vrcp.f32 %v1849_v25  ;;  %v2016_v58 = vpack.c.b16 %v2010_v54, %v2009_v14  ;;  %v2007_v36 = vunpack.c.l.b16 %v1962_v40 }
 0x755   : > { %2686 = vrcp.f32 %v1843_v26  ;;  %v2008_v37 = vunpack.c.l.b16 %v1963_v52 }
 0x756   : > { %2688 = vrcp.f32 %v3750_v7  ;;  %v2026_v61 = vsel %vm197_vm0, %v2016_v58, 0 }
 0x757   : > { %1830 = vadd.xlane.f32.xlu2 %v1829_v18  ;;  %v2015_v39 = vpack.c.b16 %v2008_v37, %v2007_v36 }
 0x759   : > { %v2683_v29 = vpop.eup %2682  ;;  %v2023_v50 = vsel %vm197_vm0, %v2015_v39, 0 }
 0x75a   : > { %v2685_v19 = vpop.eup %2684  ;;  %v1944_v51 = vmul.f32 %v2683_v29, %v3664_v48  ;;  %v1858_v57 = vpop.xlane.xlu2 %1857 }
 0x75b   : > { %v1945_v21 = vmul.f32 %v2685_v19, %v3667_v4  ;;  %2039 = vmatpush.bf16.xpose.msra.mxu0 %v2029_v11  ;;  %v2687_v26 = vpop.eup %2686 }
 0x75c   : > { %v1976_v42 = vpack.c.bf16 %v1944_v51, %v1944_v51  ;;  %v2689_v41 = vpop.eup %2688  ;;  %v1943_v4 = vmul.f32 %v2687_v26, %v3659_v2  ;;  %v1282_v2 = vpop.f32.mrf.mxu2 }
 0x75d   : > { %v1977_v9 = vpack.c.bf16 %v1945_v21, %v1945_v21  ;;  %v1942_v7 = vmul.f32 %v2689_v41, %v3625_v23  ;;  %v1326_v63 = vpack.c.bf16 %v1282_v2, %v1282_v2 }
 0x75e   : > { %v2067_v48 = vunpack.c.l.b16 %v1976_v42  ;;  %v1975_v32 = vpack.c.bf16 %v1943_v4, %v1943_v4 }
 0x75f   : > { %v2068_v27 = vunpack.c.l.b16 %v1977_v9  ;;  %v1974_v60 = vpack.c.bf16 %v1942_v7, %v1942_v7  ;;  %v1996_v18 = vunpack.c.l.b16 %v1326_v63 }
 0x760   : > { %v2066_v25 = vunpack.c.l.b16 %v1975_v32 }
 0x761   : > { %v2072_v17 = vpack.c.b16 %v2068_v27, %v2067_v48  ;;  %v2065_v33 = vunpack.c.l.b16 %v1974_v60 }
 0x762   : > { %v1873_v24 = vpop.xlane.xlu2 %1872 }
 0x763   : > { %2040 = vmatpush.bf16.xpose.msra.mxu0 %v2026_v61  ;;  %v2086_v20 = vsel %vm197_vm0, %v2072_v17, 0  ;;  %v2071_v34 = vpack.c.b16 %v2066_v25, %v2065_v33  ;;  %2690 = vrcp.f32 %v1873_v24 }
 0x764   : > { %v1284_v0 = vpop.f32.mrf.mxu2 }
 0x765   : > { %v2083_v59 = vsel %vm197_vm0, %v2071_v34, 0  ;;  %v1327_v23 = vpack.c.bf16 %v1284_v0, %v1284_v0 }
 0x767   : > { %v1997_v49 = vunpack.c.l.b16 %v1327_v23 }
 0x769   : > { %v1998_v45 = vpack.c.b16 %v1997_v49, %v1996_v18  ;;  %v2691_v54 = vpop.eup %2690 }
 0x76a   : > { %v1861_v12 = vpop.xlane.xlu0 %1860  ;;  %v1953_v46 = vmul.f32 %v2691_v54, %v3680_v10 }
 0x76b   : > { %2041 = vmatpush.bf16.xpose.msra.mxu0 %v2023_v50 }
 0x76c   : > { %v1985_v42 = vpack.c.bf16 %v1953_v46, %v1953_v46  ;;  %v3810_v26 = vpop.f32.mrf.mxu2 }
 0x76e   : > { %v2122_v36 = vunpack.c.l.b16 %v1985_v42 }
 0x772   : > { %2374 = vmatmul.msk.bf16.vlgmr.msra.gmra.mxu0 %vm197_vm0, %v1998_v45 }
 0x773   : > { %2092 = vmatpush.bf16.xpose.msrb.mxu0 %v2086_v20 }
 0x774   : > { %v3816_v50 = vpop.f32.mrf.mxu2 }
 0x77a   : > { %v1864_v19 = vpop.xlane.xlu0 %1863 }
 0x77b   : > { %2093 = vmatpush.bf16.xpose.msrb.mxu0 %v2083_v59 }
 0x77c   : > { %v3821_v49 = vpop.f32.mrf.mxu2 }
 0x78a   : > { %v1867_v29 = vpop.xlane.xlu1 %1866 }
 0x78b   : > { %2692 = vrcp.f32 %v1867_v29 }
 0x78c   : > { %2694 = vrcp.f32 %v1864_v19 }
 0x791   : > { %v2693_v51 = vpop.eup %2692 }
 0x792   : > { %v2695_v21 = vpop.eup %2694  ;;  %v1888_v62 = vpop.xlane.xlu0 %1887  ;;  %v1951_v9 = vmul.f32 %v2693_v51, %v3696_v5 }
 0x793   : > { %v1950_v41 = vmul.f32 %v2695_v21, %v3690_v53 }
 0x794   : > { %v1983_v10 = vpack.c.bf16 %v1951_v9, %v1951_v9 }
 0x795   : > { %v1982_v4 = vpack.c.bf16 %v1950_v41, %v1950_v41 }
 0x796   : > { %v2120_v39 = vunpack.c.l.b16 %v1983_v10 }
 0x797   : > { %v2119_v32 = vunpack.c.l.b16 %v1982_v4 }
 0x799   : > { %v2125_v53 = vpack.c.b16 %v2120_v39, %v2119_v32 }
 0x79a   : > { %v1870_v11 = vpop.xlane.xlu1 %1869  ;;  %v1882_v5 = vpop.xlane.xlu0 %1881 }
 0x79b   : > { %2696 = vrcp.f32 %v1870_v11  ;;  %v2137_v59 = vsel %vm197_vm0, %v2125_v53, 0 }
 0x79c   : > { %2698 = vrcp.f32 %v1861_v12 }
 0x79d   : > { %2700 = vrcp.f32 %v1858_v57 }
 0x7a1   : > { %v2697_v14 = vpop.eup %2696 }
 0x7a2   : > { %v1952_v58 = vmul.f32 %v2697_v14, %v3712_v56  ;;  %v1891_v40 = vpop.xlane.xlu1 %1890  ;;  %v2699_v48 = vpop.eup %2698 }
 0x7a3   : > { %v2701_v37 = vpop.eup %2700  ;;  %v1949_v17 = vmul.f32 %v2699_v48, %v3685_v30  ;;  %v1855_v63 = vpop.xlane.xlu0 %1854 }
 0x7a4   : > { %v1984_v52 = vpack.c.bf16 %v1952_v58, %v1952_v58  ;;  %v1948_v60 = vmul.f32 %v2701_v37, %v3676_v16 }
 0x7a5   : > { %v1981_v20 = vpack.c.bf16 %v1949_v17, %v1949_v17 }
 0x7a6   : > { %v2121_v61 = vunpack.c.l.b16 %v1984_v52  ;;  %v1980_v25 = vpack.c.bf16 %v1948_v60, %v1948_v60  ;;  %v3828_v52 = vpop.f32.mrf.mxu2 }
 0x7a7   : > { %v2118_v2 = vunpack.c.l.b16 %v1981_v20 }
 0x7a8   : > { %v2126_v27 = vpack.c.b16 %v2122_v36, %v2121_v61  ;;  %v2117_v0 = vunpack.c.l.b16 %v1980_v25 }
 0x7aa   : > { %v1894_v7 = vpop.xlane.xlu1 %1893  ;;  %v2140_v56 = vsel %vm197_vm0, %v2126_v27, 0  ;;  %v2124_v16 = vpack.c.b16 %v2118_v2, %v2117_v0 }
 0x7ab   : > { %2146 = vmatpush.bf16.xpose.msrb.mxu3 %v2140_v56  ;;  %2702 = vrcp.f32 %v1894_v7  ;;  %v1876_v14 = vpop.xlane.xlu0 %1875 }
 0x7ac   : > { %2704 = vrcp.f32 %v1891_v40  ;;  %v2134_v29 = vsel %vm197_vm0, %v2124_v16, 0 }
 0x7ad   : > { %2706 = vrcp.f32 %v1888_v62 }
 0x7ae   : > { %v1297_v0 = vpop.f32.mrf.mxu2 }
 0x7b1   : > { %v2703_v30 = vpop.eup %2702 }
 0x7b2   : > { %v1885_v33 = vpop.xlane.xlu1 %1884  ;;  %v1897_v34 = vpop.xlane.xlu2 %1896  ;;  %v1960_v18 = vmul.f32 %v2703_v30, %v3742_v15 }
 0x7b3   : > { %2147 = vmatpush.bf16.xpose.msrb.mxu3 %v2137_v59  ;;  %2708 = vrcp.f32 %v1897_v34  ;;  %v2705_v23 = vpop.eup %2704 }
 0x7b4   : > { %2710 = vrcp.f32 %v3733_v6  ;;  %v2707_v45 = vpop.eup %2706  ;;  %v1959_v19 = vmul.f32 %v2705_v23, %v3726_v22  ;;  %v1992_v6 = vpack.c.bf16 %v1960_v18, %v1960_v18 }
 0x7b5   : > { %2712 = vrcp.f32 %v1885_v33  ;;  %v1958_v15 = vmul.f32 %v2707_v45, %v3702_v38 }
 0x7b6   : > { %2714 = vrcp.f32 %v1882_v5  ;;  %v1991_v51 = vpack.c.bf16 %v1959_v19, %v1959_v19  ;;  %v2175_v62 = vunpack.c.l.b16 %v1992_v6 }
 0x7b7   : > { %v1990_v42 = vpack.c.bf16 %v1958_v15, %v1958_v15 }
 0x7b8   : > { %v2174_v36 = vunpack.c.l.b16 %v1991_v51 }
 0x7b9   : > { %v2709_v57 = vpop.eup %2708 }
 0x7ba   : > { %v1828_v12 = vpop.xlane.xlu1 %1827  ;;  %v1837_v24 = vpop.xlane.xlu2 %1836  ;;  %v1961_v11 = vmul.f32 %v2709_v57, %v3754_v55 }
 0x7bb   : > { %2148 = vmatpush.bf16.xpose.msrb.mxu3 %v2134_v29  ;;  %v2711_v54 = vpop.eup %2710  ;;  %2716 = vrcp.f32 %v1837_v24 }
 0x7bc   : > { %2718 = vrcp.f32 %v1855_v63  ;;  %v1993_v46 = vpack.c.bf16 %v1961_v11, %v1961_v11  ;;  %v2713_v21 = vpop.eup %2712  ;;  %v1940_v40 = vmul.f32 %v2711_v54, %v3596_v13  ;;  %v2173_v13 = vunpack.c.l.b16 %v1990_v42 }
 0x7bd   : > { %v2715_v22 = vpop.eup %2714  ;;  %2720 = vrcp.f32 %v1876_v14  ;;  %v1957_v38 = vmul.f32 %v2713_v21, %v3752_v43  ;;  %v1328_v42 = vpack.c.bf16 %v3810_v26, %v3810_v26 }
 0x7be   : > { %v2176_v58 = vunpack.c.l.b16 %v1993_v46  ;;  %v1972_v4 = vpack.c.bf16 %v1940_v40, %v1940_v40  ;;  %v1956_v7 = vmul.f32 %v2715_v22, %v3709_v3  ;;  %v2179_v56 = vpack.c.b16 %v2174_v36, %v2173_v13 }
 0x7bf   : > { %v1989_v17 = vpack.c.bf16 %v1957_v38, %v1957_v38  ;;  %v2050_v36 = vunpack.c.l.b16 %v1328_v42 }
 0x7c0   : > { %v2180_v9 = vpack.c.b16 %v2176_v58, %v2175_v62  ;;  %v2063_v5 = vunpack.c.l.b16 %v1972_v4  ;;  %v1988_v20 = vpack.c.bf16 %v1956_v7, %v1956_v7  ;;  %v2191_v33 = vsel %vm197_vm0, %v2179_v56, 0  ;;  %v1299_v58 = vpop.f32.mrf.mxu2 }
 0x7c1   : > { %v2717_v55 = vpop.eup %2716  ;;  %v2172_v59 = vunpack.c.l.b16 %v1989_v17 }
 0x7c2   : > { %v1879_v41 = vpop.xlane.xlu1 %1878  ;;  %v1852_v61 = vpop.xlane.xlu2 %1851  ;;  %v2194_v48 = vsel %vm197_vm0, %v2180_v9, 0  ;;  %v1941_v27 = vmul.f32 %v2717_v55, %v3764_v35  ;;  %v2171_v16 = vunpack.c.l.b16 %v1988_v20  ;;  %v1333_v55 = vpack.c.bf16 %v1299_v58, %v1299_v58 }
 0x7c3   : > { %v2719_v10 = vpop.eup %2718  ;;  %2722 = vrcp.f32 %v1879_v41  ;;  %2200 = vmatpush.bf16.xpose.msra.mxu1 %v2194_v48 }
 0x7c4   : > { %2724 = vrcp.f32 %v1852_v61  ;;  %v1973_v37 = vpack.c.bf16 %v1941_v27, %v1941_v27  ;;  %v1947_v39 = vmul.f32 %v2719_v10, %v3723_v47  ;;  %v2721_v32 = vpop.eup %2720  ;;  %v2159_v38 = vunpack.c.l.b16 %v1333_v55 }
 0x7c5   : > { %2726 = vrcp.f32 %v1828_v12  ;;  %v1954_v23 = vmul.f32 %v2721_v32, %v3735_v1  ;;  %v2178_v12 = vpack.c.b16 %v2172_v59, %v2171_v16 }
 0x7c6   : > { %v2064_v43 = vunpack.c.l.b16 %v1973_v37  ;;  %v1979_v34 = vpack.c.bf16 %v1947_v39, %v1947_v39 }
 0x7c7   : > { %v1986_v11 = vpack.c.bf16 %v1954_v23, %v1954_v23 }
 0x7c8   : > { %v2070_v53 = vpack.c.b16 %v2064_v43, %v2063_v5  ;;  %v2116_v57 = vunpack.c.l.b16 %v1979_v34 }
 0x7c9   : > { %v2723_v60 = vpop.eup %2722  ;;  %v2169_v21 = vunpack.c.l.b16 %v1986_v11 }
 0x7ca   : > { %v2725_v25 = vpop.eup %2724  ;;  %v1831_v35 = vpop.xlane.xlu2 %1830  ;;  %v2080_v3 = vsel %vm197_vm0, %v2070_v53, 0  ;;  %v1955_v47 = vmul.f32 %v2723_v60, %v3777_v44  ;;  %v1331_v44 = vpack.c.bf16 %v3828_v52, %v3828_v52  ;;  %v1332_v52 = vpack.c.bf16 %v1297_v0, %v1297_v0 }
 0x7cb   : > { %v2727_v2 = vpop.eup %2726  ;;  %2728 = vrcp.f32 %v1831_v35  ;;  %v1946_v30 = vmul.f32 %v2725_v25, %v3773_v8  ;;  %2094 = vmatpush.bf16.xpose.msrb.mxu0 %v2080_v3  ;;  %2201 = vmatpush.bf16.xpose.msra.mxu1 %v2191_v33  ;;  %v1330_v8 = vpack.c.bf16 %v3821_v49, %v3821_v49 }
 0x7cc   : > { %v1938_v18 = vmul.f32 %v2727_v2, %v3762_v31  ;;  %v1987_v24 = vpack.c.bf16 %v1955_v47, %v1955_v47  ;;  %v2188_v31 = vsel %vm197_vm0, %v2178_v12, 0  ;;  %v2105_v14 = vunpack.c.l.b16 %v1331_v44 }
 0x7cd   : > { %v1978_v63 = vpack.c.bf16 %v1946_v30, %v1946_v30  ;;  %v2104_v51 = vunpack.c.l.b16 %v1330_v8 }
 0x7ce   : > { %v1970_v54 = vpack.c.bf16 %v1938_v18, %v1938_v18  ;;  %v2170_v15 = vunpack.c.l.b16 %v1987_v24 }
 0x7cf   : > { %v2115_v45 = vunpack.c.l.b16 %v1978_v63  ;;  %v2106_v9 = vpack.c.b16 %v2105_v14, %v2104_v51 }
 0x7d0   : > { %v2061_v62 = vunpack.c.l.b16 %v1970_v54  ;;  %v2177_v40 = vpack.c.b16 %v2170_v15, %v2169_v21 }
 0x7d1   : > { %v2729_v29 = vpop.eup %2728  ;;  %v2123_v19 = vpack.c.b16 %v2116_v57, %v2115_v45 }
 0x7d2   : > { %v1939_v6 = vmul.f32 %v2729_v29, %v3789_v28  ;;  %v1329_v28 = vpack.c.bf16 %v3816_v50, %v3816_v50  ;;  %v2185_v61 = vsel %vm197_vm0, %v2177_v40, 0  ;;  %v2158_v50 = vunpack.c.l.b16 %v1332_v52 }
 0x7d3   : > { %v2131_v1 = vsel %vm197_vm0, %v2123_v19, 0  ;;  %2202 = vmatpush.bf16.xpose.msra.mxu1 %v2188_v31 }
 0x7d4   : > { %2149 = vmatpush.bf16.xpose.msrb.mxu3 %v2131_v1  ;;  %v1971_v46 = vpack.c.bf16 %v1939_v6, %v1939_v6  ;;  %v2051_v26 = vunpack.c.l.b16 %v1329_v28  ;;  %v2160_v48 = vpack.c.b16 %v2159_v38, %v2158_v50 }
 0x7d6   : > { %v2062_v49 = vunpack.c.l.b16 %v1971_v46  ;;  %v2052_v10 = vpack.c.b16 %v2051_v26, %v2050_v36 }
 0x7d8   : > { %v2069_v22 = vpack.c.b16 %v2062_v49, %v2061_v62 }
 0x7da   : > { %v2077_v41 = vsel %vm197_vm0, %v2069_v22, 0 }
 0x7db   : > { %2095 = vmatpush.bf16.xpose.msrb.mxu0 %v2077_v41  ;;  %2376 = vmatmul.msk.bf16.vlgmr.msrb.gmra.mxu3 %vm197_vm0, %v2106_v9 }
 0x7dc   : > { %2203 = vmatpush.bf16.xpose.msra.mxu1 %v2185_v61 }
 0x7e2   : > { %2375 = vmatmul.msk.bf16.vlgmr.msrb.gmra.mxu0 %vm197_vm0, %v2052_v10 }
 0x7e3   : > { %2377 = vmatmul.msk.bf16.vlgmr.msra.gmra.mxu1 %vm197_vm0, %v2160_v48 }
 0x7ef   : > { %v2043_v27 = vpop.f32.mrf.mxu0 }
 0x7f0   : > { %2378 = vst.msk [vmem:[%s3308_s17 + $0x40] sm:$0xff] %vm197_vm0, %v2043_v27 }
 0x7f7   : > { %v2045_v4 = vpop.f32.mrf.mxu0 }
 0x7f8   : > { %2379 = vst.msk [vmem:[%s3308_s17 + $0x48] sm:$0xff] %vm197_vm0, %v2045_v4 }
 0x85e   : > { %v2151_v13 = vpop.f32.mrf.mxu3 }
 0x85f   : > { %v2097_v37 = vpop.f32.mrf.mxu0  ;;  %2382 = vst.msk [vmem:[%s3308_s17 + $0x60] sm:$0xff] %vm197_vm0, %v2151_v13 }
 0x860   : > { %2380 = vst.msk [vmem:[%s3308_s17 + $0x50] sm:$0xff] %vm197_vm0, %v2097_v37  ;;  %v2205_v7 = vpop.f32.mrf.mxu1 }
 0x861   : > { %2384 = vst.msk [vmem:[%s3308_s17 + $0x70] sm:$0xff] %vm197_vm0, %v2205_v7 }
 0x866   : > { %v2153_v56 = vpop.f32.mrf.mxu3 }
 0x867   : > { %v2099_v39 = vpop.f32.mrf.mxu0  ;;  %2383 = vst.msk [vmem:[%s3308_s17 + $0x68] sm:$0xff] %vm197_vm0, %v2153_v56 }
 0x868   : > { %2381 = vst.msk [vmem:[%s3308_s17 + $0x58] sm:$0xff] %vm197_vm0, %v2099_v39  ;;  %v2207_v17 = vpop.f32.mrf.mxu1 }
 0x869   : > { %2385 = vst.msk [vmem:[%s3308_s17 + $0x78] sm:$0xff] %vm197_vm0, %v2207_v17 }
 0x86a   : > { %2757 = shalt.err (!%p2754_p3)
}
 0x86b   : > { %s2794_s7 = smov 128   ;;  %s2795_s8 = smov 8  }
 0x86c   : > { %2396 = dma.vmem_to_hbm [thread:$0]  (%p2849_p5), %s2234_s26, 2048, %s2236_s27, %s2220_s13, %s2794_s7, %s2794_s7, %s2795_s8  }
 0x86d PF: > { %p2402_p4 = scmp.ge.s32.totalorder %s2792_s12, 2  ;;  %s2250_s14 = sand.u32 1, %s2780_s9  }
 0x86e   : > { %s2251_s25 = scalar_lea.sflag [#allocation3], %s2250_s14 }
 0x86f   : > { %p2399_p7 = pnand %p2402_p4, %p2853_p6 }
 0x871   : > { %p2400_p8 = pneg %p2399_p7 }
 0x873   : > { %2775 = dma.done.wait (%p2400_p8), %s2251_s25, 2048  }
 0x874   : > { %2777 = vsyncadd (%p2400_p8), %s2251_s25, 4294965248  ;;  %p12_p9 = scmp.ge.s32.totalorder %s2836_s15, 4   ;;  %s3912_s9 = smov %s2784_s10 }
 0x875   : > { %s3913_s10 = smov %s2788_s11  ;;  %s3914_s11 = smov %s2847_s18 }
 0x876   : > { %s3915_s12 = smov %s2836_s15  ;;  %14 = sbr.rel (!%p12_p9) target bundleno = 3 (0x3), region = 65 }
 0x87b   :  { %2257 = vsyncpa [#allocation3], 1 }
 0x87c   :  { %2259 = vsyncpa [#allocation3 + $0x1], 1 }

</bundles_post_ra>
